<compile_context>
chip_gen: v7x
topology: tpu7x:2x2x1
jax: 0.10.0
libtpu: 0.0.40
codegen_flags: <defaults>
</compile_context>

<pallas_src>
import jax
import jax.numpy as jnp
from jax.experimental import pallas as pl
from jax.experimental.pallas import tpu as pltpu


def _lstm_cell_kernel(x_ref, h_ref, c_ref, wx_ref, wh_ref, b_ref,
                      h_out_ref, c_out_ref):
    H = h_ref.shape[1]

    # Fused pre-activation: z = x @ Wx + h @ Wh + bias (f32 MXU accumulation,
    # one lane-dense [1,4H] bias add broadcast over the batch).
    z = jnp.dot(x_ref[...], wx_ref[...], preferred_element_type=jnp.float32)
    z = z + jnp.dot(h_ref[...], wh_ref[...], preferred_element_type=jnp.float32)
    z = z + b_ref[...].astype(jnp.float32)

    # Gate order follows .view(B, 4, H): [i | j | f | o] along the 4H axis,
    # with the module's activations: i=tanh, j=sigmoid, f=sigmoid, o=tanh.
    # j and f are contiguous -> a single sigmoid on the [B, 2H] slab.
    i = jnp.tanh(z[:, 0:H])
    jf = jax.nn.sigmoid(z[:, H:3 * H])
    j = jf[:, 0:H]
    f = jf[:, H:2 * H]
    o = jnp.tanh(z[:, 3 * H:4 * H])

    # Keep state math in f32 even for bf16 inputs; cast only at the store.
    c = c_ref[...].astype(jnp.float32)
    celldot = c * f + i * j
    statedot = jnp.tanh(celldot) * o

    h_out_ref[...] = statedot.astype(h_out_ref.dtype)
    c_out_ref[...] = celldot.astype(c_out_ref.dtype)


def _choose_block_b(B, align, max_block=256):
    """Largest multiple-of-`align` divisor of B that is <= max_block, preferring
    a grid of >= 2 tiles (so v7x's two TensorCores can both be used)."""
    if B % align != 0:
        return B
    candidates = [d for d in range(align, min(max_block, B) + 1, align)
                  if B % d == 0]
    if not candidates:
        return B
    multi = [d for d in candidates if B // d >= 2]
    return max(multi) if multi else max(candidates)


def _build_call(B, I, H, block_b, act_dtype, vmem_limit, single_buffer_weights):
    nb = B // block_b

    if single_buffer_weights:
        # Constant index_map -> double-buffering gives no overlap benefit and
        # just doubles resident-weight VMEM; keep a single buffer.
        weight_kwargs = dict(pipeline_mode=pl.Buffered(1))
    else:
        weight_kwargs = {}

    grid_spec = pltpu.PrefetchScalarGridSpec(
        num_scalar_prefetch=0,
        grid=(nb,),
        in_specs=[
            pl.BlockSpec((block_b, I), lambda i: (i, 0)),                 # x
            pl.BlockSpec((block_b, H), lambda i: (i, 0)),                 # state
            pl.BlockSpec((block_b, H), lambda i: (i, 0)),                 # cell
            pl.BlockSpec((I, 4 * H), lambda i: (0, 0), **weight_kwargs),  # Wx
            pl.BlockSpec((H, 4 * H), lambda i: (0, 0), **weight_kwargs),  # Wh
            pl.BlockSpec((1, 4 * H), lambda i: (0, 0), **weight_kwargs),  # bias
        ],
        out_specs=(
            pl.BlockSpec((block_b, H), lambda i: (i, 0)),                 # statedot
            pl.BlockSpec((block_b, H), lambda i: (i, 0)),                 # celldot
        ),
    )

    return pl.pallas_call(
        _lstm_cell_kernel,
        out_shape=(
            jax.ShapeDtypeStruct((B, H), act_dtype),
            jax.ShapeDtypeStruct((B, H), act_dtype),
        ),
        grid_spec=grid_spec,
        compiler_params=pltpu.CompilerParams(
            dimension_semantics=("parallel",),
            vmem_limit_bytes=vmem_limit,
        ),
    )


def lstm_cell_fused(x, state, cell, wx, wh, bias, *, block_b=None,
                    weight_dtype=None):
    """One MyLSTMCellFused step.

    x: [B, I], state/cell: [B, H], wx: [I, 4H], wh: [H, 4H], bias: [4, H].
    Returns (statedot, celldot), each [B, H] in x.dtype.
    """
    B, I = x.shape
    H = state.shape[1]
    assert state.shape == (B, H) and cell.shape == (B, H)
    assert wx.shape == (I, 4 * H)
    assert wh.shape == (H, 4 * H)
    assert bias.shape == (4, H)

    act_dtype = x.dtype
    itemsize = jnp.dtype(act_dtype).itemsize
    # Sublane packing: 8 rows/tile for 32-bit, 16 for bf16, 32 for 8-bit.
    align = {4: 8, 2: 16, 1: 32}.get(itemsize, 8)

    # Weight dtype: bf16 when activations are bf16 (half HBM traffic, half
    # resident VMEM, native MXU rate); keep the parameter dtype for f32
    # activations so f32 reference semantics are preserved exactly.
    if weight_dtype is None:
        weight_dtype = jnp.bfloat16 if act_dtype == jnp.bfloat16 else wx.dtype
    wx_k = wx if wx.dtype == weight_dtype else wx.astype(weight_dtype)
    wh_k = wh if wh.dtype == weight_dtype else wh.astype(weight_dtype)
    # Bias as a single lane-dense [1, 4H] f32 row -> one VPU add in the kernel.
    bias_row = bias.reshape(1, 4 * H).astype(jnp.float32)

    # Pad a ragged batch up to the sublane alignment instead of collapsing to
    # one giant tile.
    B_pad = ((B + align - 1) // align) * align
    if B_pad != B:
        pad = ((0, B_pad - B), (0, 0))
        x = jnp.pad(x, pad)
        state = jnp.pad(state, pad)
        cell = jnp.pad(cell, pad)

    if block_b is None or B_pad % block_b != 0 or block_b % align != 0:
        block_b = _choose_block_b(B_pad, align)

    # VMEM budget: single-buffered weights + double-buffered activation/output
    # tiles + the in-kernel [block_b, 4H] f32 pre-activation & gate temporaries.
    w_itemsize = jnp.dtype(weight_dtype).itemsize
    w_bytes = (wx_k.size + wh_k.size) * w_itemsize + 4 * H * 4
    act_bytes = 2 * block_b * (I + 2 * H) * itemsize       # x, state, cell
    out_bytes = 2 * block_b * (2 * H) * itemsize           # statedot, celldot
    tmp_bytes = 2 * block_b * (4 * H) * 4                  # z + gates (f32)
    need = w_bytes + act_bytes + out_bytes + tmp_bytes + (2 << 20)

    try:
        vmem_cap = pltpu.get_tpu_info().vmem_capacity_bytes
    except Exception:                      # not on TPU / API drift: assume v7x
        vmem_cap = 64 << 20
    # Always set the limit explicitly (v5e's scoped default is only 16 MiB),
    # keep ~12.5% headroom for compiler scratch, never exceed physical VMEM.
    vmem_limit = int(min(max(need, 16 << 20), (vmem_cap * 7) // 8))

    args = (x, state, cell, wx_k, wh_k, bias_row)
    try:
        call = _build_call(B_pad, I, H, block_b, act_dtype, vmem_limit,
                           single_buffer_weights=True)
        statedot, celldot = call(*args)
    except Exception:
        # pl.Buffered(1) not supported by this jax/Mosaic version -> default
        # (double-buffered) weight specs; identical numerics, more VMEM.
        call = _build_call(B_pad, I, H, block_b, act_dtype, vmem_limit,
                           single_buffer_weights=False)
        statedot, celldot = call(*args)

    if B_pad != B:
        statedot = statedot[:B]
        celldot = celldot[:B]
    return statedot, celldot


def _reference(x, state, cell, wx, wh, bias):
    """Pure-JAX reference mirroring the PyTorch forward exactly (f32 math)."""
    f32 = jnp.float32
    x, state, cell = x.astype(f32), state.astype(f32), cell.astype(f32)
    wx, wh, bias = wx.astype(f32), wh.astype(f32), bias.astype(f32)
    B, H = state.shape
    xdot = (x @ wx).reshape(B, 4, H)
    hdot = (state @ wh).reshape(B, 4, H)
    i = jnp.tanh(xdot[:, 0] + hdot[:, 0] + bias[0])
    j = jax.nn.sigmoid(xdot[:, 1] + hdot[:, 1] + bias[1])
    f = jax.nn.sigmoid(xdot[:, 2] + hdot[:, 2] + bias[2])
    o = jnp.tanh(xdot[:, 3] + hdot[:, 3] + bias[3])
    celldot = cell * f + i * j
    statedot = jnp.tanh(celldot) * o
    return statedot, celldot


if __name__ == "__main__":
    key = jax.random.PRNGKey(0)

    def make_inputs(k, B, I, H, dtype):
        kx, kh, kc, kwx, kwh, kb = jax.random.split(k, 6)
        stdv = 1.0 / jnp.sqrt(jnp.float32(H))
        x = jax.random.normal(kx, (B, I), dtype=jnp.float32).astype(dtype)
        state = jax.random.normal(kh, (B, H), dtype=jnp.float32).astype(dtype)
        cell = jax.random.normal(kc, (B, H), dtype=jnp.float32).astype(dtype)
        wx = jax.random.uniform(kwx, (I, 4 * H), minval=-stdv, maxval=stdv,
                                dtype=jnp.float32)
        wh = jax.random.uniform(kwh, (H, 4 * H), minval=-stdv, maxval=stdv,
                                dtype=jnp.float32)
        bias = jax.random.uniform(kb, (4, H), minval=-stdv, maxval=stdv,
                                  dtype=jnp.float32)
        return x, state, cell, wx, wh, bias

    k1, k2 = jax.random.split(key)

    # 1) f32, single lane/sublane-aligned batch tile: exact parity with the
    #    f32 reference (weights stay f32 on this path).
    x, state, cell, wx, wh, bias = make_inputs(k1, 8, 128, 128, jnp.float32)
    s_out, c_out = lstm_cell_fused(x, state, cell, wx, wh, bias)
    jax.block_until_ready((s_out, c_out))
    s_ref, c_ref = _reference(x, state, cell, wx, wh, bias)
    assert jnp.allclose(s_out, s_ref, atol=1e-5, rtol=1e-5)
    assert jnp.allclose(c_out, c_ref, atol=1e-5, rtol=1e-5)

    # 2) bf16, B=32 -> two batch tiles of 16: exercises the multi-tile grid
    #    (dual-TC sharding on v7x) and the bf16-resident-weight path.
    x, state, cell, wx, wh, bias = make_inputs(k2, 32, 256, 128, jnp.bfloat16)
    wx_b = wx.astype(jnp.bfloat16)
    wh_b = wh.astype(jnp.bfloat16)
    bias_b = bias.astype(jnp.bfloat16)
    s_out, c_out = lstm_cell_fused(x, state, cell, wx_b, wh_b, bias_b)
    jax.block_until_ready((s_out, c_out))
    s_ref, c_ref = _reference(x, state, cell, wx_b, wh_b, bias_b)
    assert jnp.allclose(s_out.astype(jnp.float32), s_ref, atol=3e-2, rtol=3e-2)
    assert jnp.allclose(c_out.astype(jnp.float32), c_ref, atol=3e-2, rtol=3e-2)

    print("KERNEL_OK")
</pallas_src>

<mosaic_0001>
module attributes {stable_mosaic.version = 11 : i64} {
  func.func @_lstm_cell_kernel(%arg0: i32, %arg1: memref<8x128xf32, #tpu.memory_space<vmem>>, %arg2: memref<8x128xf32, #tpu.memory_space<vmem>>, %arg3: memref<8x128xf32, #tpu.memory_space<vmem>>, %arg4: memref<128x512xf32, #tpu.memory_space<vmem>>, %arg5: memref<128x512xf32, #tpu.memory_space<vmem>>, %arg6: memref<1x512xf32, #tpu.memory_space<vmem>>, %arg7: memref<8x128xf32, #tpu.memory_space<vmem>>, %arg8: memref<8x128xf32, #tpu.memory_space<vmem>>) attributes {dimension_semantics = [#tpu.dimension_semantics<parallel>], iteration_bounds = array<i64: 1>, scalar_prefetch = 0 : i64, scratch_operands = 0 : i64, tpu.core_type = #tpu.core_type<tc>, window_params = [{transform_indices = @transform_0, window_bounds = array<i64: 8, 128>}, {transform_indices = @transform_1, window_bounds = array<i64: 8, 128>}, {transform_indices = @transform_2, window_bounds = array<i64: 8, 128>}, {pipeline_mode = #tpu.pipeline_mode<synchronous>, transform_indices = @transform_3, window_bounds = array<i64: 128, 512>}, {pipeline_mode = #tpu.pipeline_mode<synchronous>, transform_indices = @transform_4, window_bounds = array<i64: 128, 512>}, {pipeline_mode = #tpu.pipeline_mode<synchronous>, transform_indices = @transform_5, window_bounds = array<i64: 1, 512>}, {transform_indices = @transform_6, window_bounds = array<i64: 8, 128>}, {transform_indices = @transform_7, window_bounds = array<i64: 8, 128>}]} {
    %c0 = arith.constant 0 : index
    %c0_0 = arith.constant 0 : index
    %0 = vector.load %arg1[%c0, %c0_0] : memref<8x128xf32, #tpu.memory_space<vmem>>, vector<8x128xf32>
    %c0_1 = arith.constant 0 : index
    %c0_2 = arith.constant 0 : index
    %1 = vector.load %arg4[%c0_1, %c0_2] : memref<128x512xf32, #tpu.memory_space<vmem>>, vector<128x512xf32>
    %cst = arith.constant dense<0.000000e+00> : vector<8x512xf32>
    %2 = tpu.matmul %0, %1, %cst {dimension_numbers = #tpu.dot_dimension_numbers<[1], [0], [0], [1], [0, 0, 1, 1], [], []>} : vector<8x128xf32>, vector<128x512xf32>, vector<8x512xf32> -> vector<8x512xf32>
    %c0_3 = arith.constant 0 : index
    %c0_4 = arith.constant 0 : index
    %3 = vector.load %arg2[%c0_3, %c0_4] : memref<8x128xf32, #tpu.memory_space<vmem>>, vector<8x128xf32>
    %c0_5 = arith.constant 0 : index
    %c0_6 = arith.constant 0 : index
    %4 = vector.load %arg5[%c0_5, %c0_6] : memref<128x512xf32, #tpu.memory_space<vmem>>, vector<128x512xf32>
    %cst_7 = arith.constant dense<0.000000e+00> : vector<8x512xf32>
    %5 = tpu.matmul %3, %4, %cst_7 {dimension_numbers = #tpu.dot_dimension_numbers<[1], [0], [0], [1], [0, 0, 1, 1], [], []>} : vector<8x128xf32>, vector<128x512xf32>, vector<8x512xf32> -> vector<8x512xf32>
    %6 = arith.addf %2, %5 : vector<8x512xf32>
    %c0_8 = arith.constant 0 : index
    %c0_9 = arith.constant 0 : index
    %7 = vector.load %arg6[%c0_8, %c0_9] : memref<1x512xf32, #tpu.memory_space<vmem>>, vector<1x512xf32>
    %8 = vector.broadcast %7 : vector<1x512xf32> to vector<8x512xf32>
    %9 = arith.addf %6, %8 : vector<8x512xf32>
    %10 = vector.extract_strided_slice %9 {offsets = [0, 0], sizes = [8, 128], strides = [1, 1]} : vector<8x512xf32> to vector<8x128xf32>
    %11 = math.tanh %10 : vector<8x128xf32>
    %12 = vector.extract_strided_slice %9 {offsets = [0, 128], sizes = [8, 256], strides = [1, 1]} : vector<8x512xf32> to vector<8x256xf32>
    %13 = arith.negf %12 : vector<8x256xf32>
    %14 = math.exp %13 : vector<8x256xf32>
    %cst_10 = arith.constant 1.000000e+00 : f32
    %15 = vector.broadcast %cst_10 : f32 to vector<8x256xf32>
    %16 = arith.addf %15, %14 : vector<8x256xf32>
    %17 = arith.divf %15, %16 : vector<8x256xf32>
    %18 = vector.extract_strided_slice %17 {offsets = [0, 0], sizes = [8, 128], strides = [1, 1]} : vector<8x256xf32> to vector<8x128xf32>
    %19 = vector.extract_strided_slice %17 {offsets = [0, 128], sizes = [8, 128], strides = [1, 1]} : vector<8x256xf32> to vector<8x128xf32>
    %20 = vector.extract_strided_slice %9 {offsets = [0, 384], sizes = [8, 128], strides = [1, 1]} : vector<8x512xf32> to vector<8x128xf32>
    %21 = math.tanh %20 : vector<8x128xf32>
    %c0_11 = arith.constant 0 : index
    %c0_12 = arith.constant 0 : index
    %22 = vector.load %arg3[%c0_11, %c0_12] : memref<8x128xf32, #tpu.memory_space<vmem>>, vector<8x128xf32>
    %23 = arith.mulf %22, %19 : vector<8x128xf32>
    %24 = arith.mulf %11, %18 : vector<8x128xf32>
    %25 = arith.addf %23, %24 : vector<8x128xf32>
    %26 = math.tanh %25 : vector<8x128xf32>
    %27 = arith.mulf %26, %21 : vector<8x128xf32>
    %c0_13 = arith.constant 0 : index
    %c0_14 = arith.constant 0 : index
    %28 = vector.load %arg7[%c0_13, %c0_14] : memref<8x128xf32, #tpu.memory_space<vmem>>, vector<8x128xf32>
    tpu.vector_store %arg7[%c0_13, %c0_14], %27 {strides = array<i32>} : memref<8x128xf32, #tpu.memory_space<vmem>>, vector<8x128xf32>,
    %c0_15 = arith.constant 0 : index
    %c0_16 = arith.constant 0 : index
    %29 = vector.load %arg8[%c0_15, %c0_16] : memref<8x128xf32, #tpu.memory_space<vmem>>, vector<8x128xf32>
    tpu.vector_store %arg8[%c0_15, %c0_16], %25 {strides = array<i32>} : memref<8x128xf32, #tpu.memory_space<vmem>>, vector<8x128xf32>,
    return
  }
  func.func @transform_0(%arg0: i32) -> (i32, i32) {
    %c0_i32 = arith.constant 0 : i32
    %c0_i32_0 = arith.constant 0 : i32
    return %arg0, %c0_i32 : i32, i32
  }
  func.func @transform_1(%arg0: i32) -> (i32, i32) {
    %c0_i32 = arith.constant 0 : i32
    %c0_i32_0 = arith.constant 0 : i32
    return %arg0, %c0_i32 : i32, i32
  }
  func.func @transform_2(%arg0: i32) -> (i32, i32) {
    %c0_i32 = arith.constant 0 : i32
    %c0_i32_0 = arith.constant 0 : i32
    return %arg0, %c0_i32 : i32, i32
  }
  func.func @transform_3(%arg0: i32) -> (i32, i32) {
    %c0_i32 = arith.constant 0 : i32
    %c0_i32_0 = arith.constant 0 : i32
    %c0_i32_1 = arith.constant 0 : i32
    return %c0_i32, %c0_i32_0 : i32, i32
  }
  func.func @transform_4(%arg0: i32) -> (i32, i32) {
    %c0_i32 = arith.constant 0 : i32
    %c0_i32_0 = arith.constant 0 : i32
    %c0_i32_1 = arith.constant 0 : i32
    return %c0_i32, %c0_i32_0 : i32, i32
  }
  func.func @transform_5(%arg0: i32) -> (i32, i32) {
    %c0_i32 = arith.constant 0 : i32
    %c0_i32_0 = arith.constant 0 : i32
    %c0_i32_1 = arith.constant 0 : i32
    return %c0_i32, %c0_i32_0 : i32, i32
  }
  func.func @transform_6(%arg0: i32) -> (i32, i32) {
    %c0_i32 = arith.constant 0 : i32
    %c0_i32_0 = arith.constant 0 : i32
    return %arg0, %c0_i32 : i32, i32
  }
  func.func @transform_7(%arg0: i32) -> (i32, i32) {
    %c0_i32 = arith.constant 0 : i32
    %c0_i32_0 = arith.constant 0 : i32
    return %arg0, %c0_i32 : i32, i32
  }
}

module attributes {stable_mosaic.version = 11 : i64} {
  func.func @_lstm_cell_kernel(%arg0: i32, %arg1: memref<8x128xf32, #tpu.memory_space<vmem>>, %arg2: memref<8x128xf32, #tpu.memory_space<vmem>>, %arg3: memref<8x128xf32, #tpu.memory_space<vmem>>, %arg4: memref<128x512xf32, #tpu.memory_space<vmem>>, %arg5: memref<128x512xf32, #tpu.memory_space<vmem>>, %arg6: memref<1x512xf32, #tpu.memory_space<vmem>>, %arg7: memref<8x128xf32, #tpu.memory_space<vmem>>, %arg8: memref<8x128xf32, #tpu.memory_space<vmem>>) attributes {dimension_semantics = [#tpu.dimension_semantics<parallel>], iteration_bounds = array<i64: 1>, scalar_prefetch = 0 : i64, scratch_operands = 0 : i64, tpu.core_type = #tpu.core_type<tc>, window_params = [{transform_indices = @transform_0, window_bounds = array<i64: 8, 128>}, {transform_indices = @transform_1, window_bounds = array<i64: 8, 128>}, {transform_indices = @transform_2, window_bounds = array<i64: 8, 128>}, {pipeline_mode = #tpu.pipeline_mode<synchronous>, transform_indices = @transform_3, window_bounds = array<i64: 128, 512>}, {pipeline_mode = #tpu.pipeline_mode<synchronous>, transform_indices = @transform_4, window_bounds = array<i64: 128, 512>}, {pipeline_mode = #tpu.pipeline_mode<synchronous>, transform_indices = @transform_5, window_bounds = array<i64: 1, 512>}, {transform_indices = @transform_6, window_bounds = array<i64: 8, 128>}, {transform_indices = @transform_7, window_bounds = array<i64: 8, 128>}]} {
    %c0 = arith.constant 0 : index
    %c0_0 = arith.constant 0 : index
    %0 = vector.load %arg1[%c0, %c0_0] : memref<8x128xf32, #tpu.memory_space<vmem>>, vector<8x128xf32>
    %c0_1 = arith.constant 0 : index
    %c0_2 = arith.constant 0 : index
    %1 = vector.load %arg4[%c0_1, %c0_2] : memref<128x512xf32, #tpu.memory_space<vmem>>, vector<128x512xf32>
    %cst = arith.constant dense<0.000000e+00> : vector<8x512xf32>
    %2 = tpu.matmul %0, %1, %cst {dimension_numbers = #tpu.dot_dimension_numbers<[1], [0], [0], [1], [0, 0, 1, 1], [], []>} : vector<8x128xf32>, vector<128x512xf32>, vector<8x512xf32> -> vector<8x512xf32>
    %c0_3 = arith.constant 0 : index
    %c0_4 = arith.constant 0 : index
    %3 = vector.load %arg2[%c0_3, %c0_4] : memref<8x128xf32, #tpu.memory_space<vmem>>, vector<8x128xf32>
    %c0_5 = arith.constant 0 : index
    %c0_6 = arith.constant 0 : index
    %4 = vector.load %arg5[%c0_5, %c0_6] : memref<128x512xf32, #tpu.memory_space<vmem>>, vector<128x512xf32>
    %cst_7 = arith.constant dense<0.000000e+00> : vector<8x512xf32>
    %5 = tpu.matmul %3, %4, %cst_7 {dimension_numbers = #tpu.dot_dimension_numbers<[1], [0], [0], [1], [0, 0, 1, 1], [], []>} : vector<8x128xf32>, vector<128x512xf32>, vector<8x512xf32> -> vector<8x512xf32>
    %6 = arith.addf %2, %5 : vector<8x512xf32>
    %c0_8 = arith.constant 0 : index
    %c0_9 = arith.constant 0 : index
    %7 = vector.load %arg6[%c0_8, %c0_9] : memref<1x512xf32, #tpu.memory_space<vmem>>, vector<1x512xf32>
    %8 = vector.broadcast %7 : vector<1x512xf32> to vector<8x512xf32>
    %9 = arith.addf %6, %8 : vector<8x512xf32>
    %10 = vector.extract_strided_slice %9 {offsets = [0, 0], sizes = [8, 128], strides = [1, 1]} : vector<8x512xf32> to vector<8x128xf32>
    %11 = math.tanh %10 : vector<8x128xf32>
    %12 = vector.extract_strided_slice %9 {offsets = [0, 128], sizes = [8, 256], strides = [1, 1]} : vector<8x512xf32> to vector<8x256xf32>
    %13 = arith.negf %12 : vector<8x256xf32>
    %14 = math.exp %13 : vector<8x256xf32>
    %cst_10 = arith.constant 1.000000e+00 : f32
    %15 = vector.broadcast %cst_10 : f32 to vector<8x256xf32>
    %16 = arith.addf %15, %14 : vector<8x256xf32>
    %17 = arith.divf %15, %16 : vector<8x256xf32>
    %18 = vector.extract_strided_slice %17 {offsets = [0, 0], sizes = [8, 128], strides = [1, 1]} : vector<8x256xf32> to vector<8x128xf32>
    %19 = vector.extract_strided_slice %17 {offsets = [0, 128], sizes = [8, 128], strides = [1, 1]} : vector<8x256xf32> to vector<8x128xf32>
    %20 = vector.extract_strided_slice %9 {offsets = [0, 384], sizes = [8, 128], strides = [1, 1]} : vector<8x512xf32> to vector<8x128xf32>
    %21 = math.tanh %20 : vector<8x128xf32>
    %c0_11 = arith.constant 0 : index
    %c0_12 = arith.constant 0 : index
    %22 = vector.load %arg3[%c0_11, %c0_12] : memref<8x128xf32, #tpu.memory_space<vmem>>, vector<8x128xf32>
    %23 = arith.mulf %22, %19 : vector<8x128xf32>
    %24 = arith.mulf %11, %18 : vector<8x128xf32>
    %25 = arith.addf %23, %24 : vector<8x128xf32>
    %26 = math.tanh %25 : vector<8x128xf32>
    %27 = arith.mulf %26, %21 : vector<8x128xf32>
    %c0_13 = arith.constant 0 : index
    %c0_14 = arith.constant 0 : index
    %28 = vector.load %arg7[%c0_13, %c0_14] : memref<8x128xf32, #tpu.memory_space<vmem>>, vector<8x128xf32>
    tpu.vector_store %arg7[%c0_13, %c0_14], %27 {strides = array<i32>} : memref<8x128xf32, #tpu.memory_space<vmem>>, vector<8x128xf32>,
    %c0_15 = arith.constant 0 : index
    %c0_16 = arith.constant 0 : index
    %29 = vector.load %arg8[%c0_15, %c0_16] : memref<8x128xf32, #tpu.memory_space<vmem>>, vector<8x128xf32>
    tpu.vector_store %arg8[%c0_15, %c0_16], %25 {strides = array<i32>} : memref<8x128xf32, #tpu.memory_space<vmem>>, vector<8x128xf32>,
    return
  }
  func.func @transform_0(%arg0: i32) -> (i32, i32) {
    %c0_i32 = arith.constant 0 : i32
    %c0_i32_0 = arith.constant 0 : i32
    return %arg0, %c0_i32 : i32, i32
  }
  func.func @transform_1(%arg0: i32) -> (i32, i32) {
    %c0_i32 = arith.constant 0 : i32
    %c0_i32_0 = arith.constant 0 : i32
    return %arg0, %c0_i32 : i32, i32
  }
  func.func @transform_2(%arg0: i32) -> (i32, i32) {
    %c0_i32 = arith.constant 0 : i32
    %c0_i32_0 = arith.constant 0 : i32
    return %arg0, %c0_i32 : i32, i32
  }
  func.func @transform_3(%arg0: i32) -> (i32, i32) {
    %c0_i32 = arith.constant 0 : i32
    %c0_i32_0 = arith.constant 0 : i32
    %c0_i32_1 = arith.constant 0 : i32
    return %c0_i32, %c0_i32_0 : i32, i32
  }
  func.func @transform_4(%arg0: i32) -> (i32, i32) {
    %c0_i32 = arith.constant 0 : i32
    %c0_i32_0 = arith.constant 0 : i32
    %c0_i32_1 = arith.constant 0 : i32
    return %c0_i32, %c0_i32_0 : i32, i32
  }
  func.func @transform_5(%arg0: i32) -> (i32, i32) {
    %c0_i32 = arith.constant 0 : i32
    %c0_i32_0 = arith.constant 0 : i32
    %c0_i32_1 = arith.constant 0 : i32
    return %c0_i32, %c0_i32_0 : i32, i32
  }
  func.func @transform_6(%arg0: i32) -> (i32, i32) {
    %c0_i32 = arith.constant 0 : i32
    %c0_i32_0 = arith.constant 0 : i32
    return %arg0, %c0_i32 : i32, i32
  }
  func.func @transform_7(%arg0: i32) -> (i32, i32) {
    %c0_i32 = arith.constant 0 : i32
    %c0_i32_0 = arith.constant 0 : i32
    return %arg0, %c0_i32 : i32, i32
  }
}

</mosaic_0001>

<bundles_post_ra>
// kernel: tpu_custom_call.1
= control target key start
LH: loop header
LB: loop body
LE: loop exit
PB: predicated region body
PF: predicated region fallthrough
CT: control target
= control target key end

     0   :  { %13 = vsyncpa [#allocation3], 0  ;;  %s1058_s0 = inlined_call_operand.hbm [shape: f32[8,128], index: 0, kind: input, shape index: {}]   ;;  %s1059_s1 = inlined_call_operand.hbm [shape: f32[8,128], index: 1, kind: input, shape index: {}]   ;;  %s1060_s2 = inlined_call_operand.hbm [shape: f32[8,128], index: 2, kind: input, shape index: {}]   ;;  %s1061_s3 = inlined_call_operand.hbm [shape: f32[128,512], index: 3, kind: input, shape index: {}]   ;;  %s1062_s4 = inlined_call_operand.hbm [shape: f32[128,512], index: 4, kind: input, shape index: {}]   ;;  %s1063_s5 = inlined_call_operand.vmem [shape: f32[1,512], index: 5, kind: input, shape index: {}]   ;;  %s1064_s6 = inlined_call_operand.hbm [shape: f32[8,128], index: 6, kind: output, shape index: {0}]   ;;  %s1065_s7 = inlined_call_operand.hbm [shape: f32[8,128], index: 7, kind: output, shape index: {1}]  }
   0x1   :  { %14 = vsyncpa [#allocation6], 0 }
   0x2   :  { %15 = vsyncpa [#allocation9], 0 }
   0x3   :  { %16 = vsyncpa [#allocation4], 0 }
   0x4   :  { %17 = vsyncpa [#allocation13], 0  ;;  %s904_s24 = smov [#allocation5]   ;;  %s905_s26 = smov [#allocation8]  }
   0x5   :  { %s34_s25 = sshll.u32 %s904_s24, 4  ;;  %s53_s27 = sshll.u32 %s905_s26, 4  ;;  %s35_s25 = int_to_ptr.vmem [resolvable:$true] %s34_s25  ;;  %s954_s27 = int_to_ptr.vmem [resolvable:$true] %s53_s27 }
   0x6   :  { %s740_s30 = scalar_lea.hbm %s1059_s1, 128 }
   0x7   :  { %p741_p0 = scmp.ne.s32.totalorder %s1059_s1, %s740_s30  ;;  %p744_p1 = scmp.lt.u32.totalorder %s740_s30, %s1059_s1 }
   0x9   :  { %p746_p2 = pnand %p744_p1, %p741_p0 }
   0xb   :  { %749 = shalt.err (!%p746_p2)
}
   0xc   :  { %s750_s12 = scalar_lea.vmem %s35_s25, 128  ;;  %p755_p4 = scmp.lt.s32.totalorder %s35_s25, %s35_s25 }
   0xd   :  { %p751_p3 = scmp.ne.s32.totalorder %s35_s25, %s750_s12  ;;  %p756_p5 = scmp.lt.s32.totalorder %s750_s12, %s750_s12 }
   0xf   :  { %p757_p6 = por %p756_p5, %p755_p4 }
  0x11   :  { %p758_p7 = pnand %p757_p6, %p751_p3 }
  0x13   :  { %761 = shalt.err (!%p758_p7)
}
  0x14   :  { %37 = dma.hbm_to_vmem [thread:$0]  %s1059_s1, 128, %s35_s25, [#allocation6]  }
  0x15   :  { %s762_s17 = scalar_lea.hbm %s1061_s3, 8192 }
  0x16   :  { %p763_p8 = scmp.ne.s32.totalorder %s1061_s3, %s762_s17  ;;  %p766_p9 = scmp.lt.u32.totalorder %s762_s17, %s1061_s3 }
  0x18   :  { %p768_p10 = pnand %p766_p9, %p763_p8 }
  0x1a   :  { %771 = shalt.err (!%p768_p10)
}
  0x1b   :  { %s772_s22 = scalar_lea.vmem %s954_s27, 8192  ;;  %p777_p12 = scmp.lt.s32.totalorder %s954_s27, %s954_s27 }
  0x1c   :  { %p773_p11 = scmp.ne.s32.totalorder %s954_s27, %s772_s22  ;;  %p778_p13 = scmp.lt.s32.totalorder %s772_s22, %s772_s22 }
  0x1e   :  { %p779_p0 = por %p778_p13, %p777_p12 }
  0x20   :  { %p780_p1 = pnand %p779_p0, %p773_p11 }
  0x22   :  { %783 = shalt.err (!%p780_p1)
}
  0x23   :  { %s906_s1 = smov 512   ;;  %s907_s23 = smov 32  }
  0x24   :  { %59 = dma.hbm_to_vmem [thread:$0]  %s1061_s3, 8192, %s954_s27, [#allocation9], %s906_s1, %s906_s1, %s907_s23  }
  0x25   :  { %s908_s26 = smov [#allocation2]   ;;  %s909_s29 = smov [#allocation7]  }
  0x26   :  { %s24_s28 = sshll.u32 %s908_s26, 4  ;;  %s44_s30 = sshll.u32 %s909_s29, 4  ;;  %s25_s28 = int_to_ptr.vmem [resolvable:$true] %s24_s28  ;;  %s45_s30 = int_to_ptr.vmem [resolvable:$true] %s44_s30 }
  0x27   :  { %s784_s10 = scalar_lea.hbm %s1058_s0, 128 }
  0x28   :  { %p785_p2 = scmp.ne.s32.totalorder %s1058_s0, %s784_s10  ;;  %p788_p3 = scmp.lt.u32.totalorder %s784_s10, %s1058_s0 }
  0x2a   :  { %p790_p4 = pnand %p788_p3, %p785_p2 }
  0x2c   :  { %793 = shalt.err (!%p790_p4)
}
  0x2d   :  { %s794_s3 = scalar_lea.vmem %s25_s28, 128  ;;  %p799_p6 = scmp.lt.s32.totalorder %s25_s28, %s25_s28 }
  0x2e   :  { %p795_p5 = scmp.ne.s32.totalorder %s25_s28, %s794_s3  ;;  %p800_p7 = scmp.lt.s32.totalorder %s794_s3, %s794_s3 }
  0x30   :  { %p801_p8 = por %p800_p7, %p799_p6 }
  0x32   :  { %p802_p9 = pnand %p801_p8, %p795_p5 }
  0x34   :  { %805 = shalt.err (!%p802_p9)
}
  0x35   :  { %27 = dma.hbm_to_vmem [thread:$0]  %s1058_s0, 128, %s25_s28, [#allocation3]  }
  0x36   :  { %s806_s18 = scalar_lea.hbm %s1060_s2, 128 }
  0x37   :  { %p807_p10 = scmp.ne.s32.totalorder %s1060_s2, %s806_s18  ;;  %p810_p11 = scmp.lt.u32.totalorder %s806_s18, %s1060_s2 }
  0x39   :  { %p812_p12 = pnand %p810_p11, %p807_p10 }
  0x3b   :  { %815 = shalt.err (!%p812_p12)
}
  0x3c   :  { %s816_s24 = scalar_lea.vmem %s45_s30, 128  ;;  %p821_p0 = scmp.lt.s32.totalorder %s45_s30, %s45_s30 }
  0x3d   :  { %p817_p13 = scmp.ne.s32.totalorder %s45_s30, %s816_s24  ;;  %p822_p1 = scmp.lt.s32.totalorder %s816_s24, %s816_s24 }
  0x3f   :  { %p823_p2 = por %p822_p1, %p821_p0 }
  0x41   :  { %p824_p3 = pnand %p823_p2, %p817_p13 }
  0x43   :  { %827 = shalt.err (!%p824_p3)
}
  0x44   :  { %47 = dma.hbm_to_vmem [thread:$0]  %s1060_s2, 128, %s45_s30, [#allocation6]  }
  0x45   :  { %s910_s26 = smov [#allocation10]   ;;  %s828_s9 = scalar_lea.hbm %s1062_s4, 8192 }
  0x46   :  { %s65_s28 = sshll.u32 %s910_s26, 4  ;;  %p829_p4 = scmp.ne.s32.totalorder %s1062_s4, %s828_s9  ;;  %s66_s28 = int_to_ptr.vmem [resolvable:$true] %s65_s28 }
  0x47   :  { %p832_p5 = scmp.lt.u32.totalorder %s828_s9, %s1062_s4 }
  0x49   :  { %p834_p6 = pnand %p832_p5, %p829_p4 }
  0x4b   :  { %837 = shalt.err (!%p834_p6)
}
  0x4c   :  { %s838_s14 = scalar_lea.vmem %s66_s28, 8192  ;;  %p843_p8 = scmp.lt.s32.totalorder %s66_s28, %s66_s28 }
  0x4d   :  { %p839_p7 = scmp.ne.s32.totalorder %s66_s28, %s838_s14  ;;  %p844_p9 = scmp.lt.s32.totalorder %s838_s14, %s838_s14 }
  0x4f   :  { %p845_p10 = por %p844_p9, %p843_p8 }
  0x51   :  { %p846_p11 = pnand %p845_p10, %p839_p7 }
  0x53   :  { %849 = shalt.err (!%p846_p11)
}
  0x54   :  { %71 = dma.hbm_to_vmem [thread:$0]  %s1062_s4, 8192, %s66_s28, [#allocation9], %s906_s1, %s906_s1, %s907_s23  }
  0x55   :  { %894 = dma.done.wait [#allocation3], 128  }
  0x56   :  { %895 = vsyncadd [#allocation3], 4294967168 }
  0x57   :  { %896 = dma.done.wait [#allocation6], 256  }
  0x58   :  { %897 = vsyncadd [#allocation6], 4294967040 }
  0x59   :  { %898 = dma.done.wait [#allocation9], 16384  }
  0x5a   :  { %899 = vsyncadd [#allocation9], 4294950912  ;;  %v911_v0 = vmov 0.0   ;;  %v156_v1 = vld [vmem:[#allocation10 + $0x8] sm:$0xff]  ;;  %v158_v3 = vld [vmem:[#allocation10 + $0x18] sm:$0xff] }
  0x5b   :  { %283 = vmatprep.mubr.f32.mxu0 %v911_v0  ;;  %354 = vmatprep.mubr.f32.mxu1 %v911_v0  ;;  %v160_v2 = vld [vmem:[#allocation10 + $0x28] sm:$0xff]  ;;  %v162_v5 = vld [vmem:[#allocation10 + $0x38] sm:$0xff]  ;;  %v155_v6 = vld [vmem:[#allocation10] sm:$0xff] }
  0x5c   :  { %v584_v4 = vpack.c.bf16 %v160_v2, %v156_v1  ;;  %v159_v7 = vld [vmem:[#allocation10 + $0x20] sm:$0xff]  ;;  %v616_v8 = vpack.c.bf16 %v162_v5, %v158_v3  ;;  %v157_v10 = vld [vmem:[#allocation10 + $0x10] sm:$0xff]  ;;  %v164_v12 = vld [vmem:[#allocation10 + $0x48] sm:$0xff] }
  0x5d   :  { %v586_v9 = vpack.c.bf16 %v159_v7, %v155_v6  ;;  %v161_v11 = vld [vmem:[#allocation10 + $0x30] sm:$0xff]  ;;  %v168_v14 = vld [vmem:[#allocation10 + $0x68] sm:$0xff]  ;;  %v166_v15 = vld [vmem:[#allocation10 + $0x58] sm:$0xff] }
  0x5e   :  { %585 = vmatprep.subr.bf16.mxu0 %v584_v4  ;;  %v618_v13 = vpack.c.bf16 %v161_v11, %v157_v10  ;;  %v170_v16 = vld [vmem:[#allocation10 + $0x78] sm:$0xff]  ;;  %617 = vmatprep.subr.bf16.mxu1 %v616_v8  ;;  %v588_v17 = vpack.c.bf16 %v168_v14, %v164_v12  ;;  %v163_v19 = vld [vmem:[#allocation10 + $0x40] sm:$0xff]  ;;  %v165_v21 = vld [vmem:[#allocation10 + $0x50] sm:$0xff] }
  0x5f   :  { %587 = vmatpush1.bf16.msra.mxu0 %v586_v9  ;;  %v620_v18 = vpack.c.bf16 %v170_v16, %v166_v15  ;;  %v167_v20 = vld [vmem:[#allocation10 + $0x60] sm:$0xff]  ;;  %v169_v23 = vld [vmem:[#allocation10 + $0x70] sm:$0xff]  ;;  %v172_v24 = vld [vmem:[#allocation10 + $0x88] sm:$0xff] }
  0x60   :  { %619 = vmatpush1.bf16.msra.mxu1 %v618_v13  ;;  %v590_v22 = vpack.c.bf16 %v167_v20, %v163_v19  ;;  %v176_v25 = vld [vmem:[#allocation10 + $0xa8] sm:$0xff]  ;;  %589 = vmatprep.subr.bf16.mxu0 %v588_v17  ;;  %v622_v26 = vpack.c.bf16 %v169_v23, %v165_v21  ;;  %v174_v28 = vld [vmem:[#allocation10 + $0x98] sm:$0xff]  ;;  %v171_v30 = vld [vmem:[#allocation10 + $0x80] sm:$0xff] }
  0x61   :  { %621 = vmatprep.subr.bf16.mxu1 %v620_v18  ;;  %v592_v27 = vpack.c.bf16 %v176_v25, %v172_v24  ;;  %v178_v29 = vld [vmem:[#allocation10 + $0xb8] sm:$0xff]  ;;  %v175_v32 = vld [vmem:[#allocation10 + $0xa0] sm:$0xff]  ;;  %v173_v33 = vld [vmem:[#allocation10 + $0x90] sm:$0xff] }
  0x62   :  { %v624_v31 = vpack.c.bf16 %v178_v29, %v174_v28  ;;  %v177_v34 = vld [vmem:[#allocation10 + $0xb0] sm:$0xff]  ;;  %v594_v35 = vpack.c.bf16 %v175_v32, %v171_v30  ;;  %v180_v36 = vld [vmem:[#allocation10 + $0xc8] sm:$0xff]  ;;  %v182_v38 = vld [vmem:[#allocation10 + $0xd8] sm:$0xff] }
  0x63   :  { %591 = vmatpush1.bf16.msra.mxu0 %v590_v22  ;;  %v184_v37 = vld [vmem:[#allocation10 + $0xe8] sm:$0xff]  ;;  %v626_v39 = vpack.c.bf16 %v177_v34, %v173_v33  ;;  %v186_v41 = vld [vmem:[#allocation10 + $0xf8] sm:$0xff]  ;;  %v179_v42 = vld [vmem:[#allocation10 + $0xc0] sm:$0xff] }
  0x64   :  { %623 = vmatpush1.bf16.msra.mxu1 %v622_v26  ;;  %593 = vmatprep.subr.bf16.mxu0 %v592_v27  ;;  %v596_v40 = vpack.c.bf16 %v184_v37, %v180_v36  ;;  %v183_v43 = vld [vmem:[#allocation10 + $0xe0] sm:$0xff]  ;;  %v628_v44 = vpack.c.bf16 %v186_v41, %v182_v38  ;;  %v181_v45 = vld [vmem:[#allocation10 + $0xd0] sm:$0xff]  ;;  %v188_v47 = vld [vmem:[#allocation10 + $0x108] sm:$0xff] }
  0x65   :  { %625 = vmatprep.subr.bf16.mxu1 %v624_v31  ;;  %v185_v46 = vld [vmem:[#allocation10 + $0xf0] sm:$0xff]  ;;  %v192_v48 = vld [vmem:[#allocation10 + $0x128] sm:$0xff]  ;;  %v190_v49 = vld [vmem:[#allocation10 + $0x118] sm:$0xff]  ;;  %v598_v51 = vpack.c.bf16 %v183_v43, %v179_v42 }
  0x66   :  { %v194_v50 = vld [vmem:[#allocation10 + $0x138] sm:$0xff]  ;;  %v630_v52 = vpack.c.bf16 %v185_v46, %v181_v45  ;;  %v600_v53 = vpack.c.bf16 %v192_v48, %v188_v47  ;;  %v187_v54 = vld [vmem:[#allocation10 + $0x100] sm:$0xff]  ;;  %v189_v56 = vld [vmem:[#allocation10 + $0x110] sm:$0xff] }
  0x67   :  { %595 = vmatpush1.bf16.msra.mxu0 %v594_v35  ;;  %v191_v55 = vld [vmem:[#allocation10 + $0x120] sm:$0xff]  ;;  %v632_v57 = vpack.c.bf16 %v194_v50, %v190_v49  ;;  %v193_v58 = vld [vmem:[#allocation10 + $0x130] sm:$0xff]  ;;  %v196_v59 = vld [vmem:[#allocation10 + $0x148] sm:$0xff] }
  0x68   :  { %627 = vmatpush1.bf16.msra.mxu1 %v626_v39  ;;  %597 = vmatprep.subr.bf16.mxu0 %v596_v40  ;;  %v200_v60 = vld [vmem:[#allocation10 + $0x168] sm:$0xff]  ;;  %v198_v61 = vld [vmem:[#allocation10 + $0x158] sm:$0xff]  ;;  %v602_v63 = vpack.c.bf16 %v191_v55, %v187_v54  ;;  %v634_v1 = vpack.c.bf16 %v193_v58, %v189_v56  ;;  %v195_v3 = vld [vmem:[#allocation10 + $0x140] sm:$0xff] }
  0x69   :  { %629 = vmatprep.subr.bf16.mxu1 %v628_v44  ;;  %v202_v62 = vld [vmem:[#allocation10 + $0x178] sm:$0xff]  ;;  %v604_v2 = vpack.c.bf16 %v200_v60, %v196_v59  ;;  %v199_v4 = vld [vmem:[#allocation10 + $0x160] sm:$0xff]  ;;  %v197_v5 = vld [vmem:[#allocation10 + $0x150] sm:$0xff] }
  0x6a   :  { %v636_v6 = vpack.c.bf16 %v202_v62, %v198_v61  ;;  %v201_v7 = vld [vmem:[#allocation10 + $0x170] sm:$0xff]  ;;  %v204_v8 = vld [vmem:[#allocation10 + $0x188] sm:$0xff]  ;;  %v206_v10 = vld [vmem:[#allocation10 + $0x198] sm:$0xff]  ;;  %v606_v12 = vpack.c.bf16 %v199_v4, %v195_v3 }
  0x6b   :  { %599 = vmatpush1.bf16.msra.mxu0 %v598_v51  ;;  %v208_v9 = vld [vmem:[#allocation10 + $0x1a8] sm:$0xff]  ;;  %v210_v11 = vld [vmem:[#allocation10 + $0x1b8] sm:$0xff]  ;;  %v638_v13 = vpack.c.bf16 %v201_v7, %v197_v5  ;;  %v203_v15 = vld [vmem:[#allocation10 + $0x180] sm:$0xff] }
  0x6c   :  { %631 = vmatpush1.bf16.msra.mxu1 %v630_v52  ;;  %601 = vmatprep.subr.bf16.mxu0 %v600_v53  ;;  %v608_v14 = vpack.c.bf16 %v208_v9, %v204_v8  ;;  %v207_v16 = vld [vmem:[#allocation10 + $0x1a0] sm:$0xff]  ;;  %v205_v17 = vld [vmem:[#allocation10 + $0x190] sm:$0xff]  ;;  %v640_v18 = vpack.c.bf16 %v210_v11, %v206_v10  ;;  %v212_v20 = vld [vmem:[#allocation10 + $0x1c8] sm:$0xff] }
  0x6d   :  { %633 = vmatprep.subr.bf16.mxu1 %v632_v57  ;;  %v209_v19 = vld [vmem:[#allocation10 + $0x1b0] sm:$0xff]  ;;  %v216_v21 = vld [vmem:[#allocation10 + $0x1e8] sm:$0xff]  ;;  %v214_v22 = vld [vmem:[#allocation10 + $0x1d8] sm:$0xff]  ;;  %v610_v24 = vpack.c.bf16 %v207_v16, %v203_v15 }
  0x6e   :  { %v218_v23 = vld [vmem:[#allocation10 + $0x1f8] sm:$0xff]  ;;  %v642_v25 = vpack.c.bf16 %v209_v19, %v205_v17  ;;  %v612_v26 = vpack.c.bf16 %v216_v21, %v212_v20  ;;  %v211_v27 = vld [vmem:[#allocation10 + $0x1c0] sm:$0xff]  ;;  %v213_v29 = vld [vmem:[#allocation10 + $0x1d0] sm:$0xff] }
  0x6f   :  { %603 = vmatpush1.bf16.msra.mxu0 %v602_v63  ;;  %v215_v28 = vld [vmem:[#allocation10 + $0x1e0] sm:$0xff]  ;;  %v644_v30 = vpack.c.bf16 %v218_v23, %v214_v22  ;;  %v217_v31 = vld [vmem:[#allocation10 + $0x1f0] sm:$0xff]  ;;  %v91_v32 = vld [vmem:[#allocation8 + $0x8] sm:$0xff] }
  0x70   :  { %635 = vmatpush1.bf16.msra.mxu1 %v634_v1  ;;  %605 = vmatprep.subr.bf16.mxu0 %v604_v2  ;;  %v95_v33 = vld [vmem:[#allocation8 + $0x28] sm:$0xff]  ;;  %v93_v34 = vld [vmem:[#allocation8 + $0x18] sm:$0xff]  ;;  %v614_v36 = vpack.c.bf16 %v215_v28, %v211_v27  ;;  %v646_v37 = vpack.c.bf16 %v217_v31, %v213_v29  ;;  %v90_v39 = vld [vmem:[#allocation8] sm:$0xff] }
  0x71   :  { %637 = vmatprep.subr.bf16.mxu1 %v636_v6  ;;  %v97_v35 = vld [vmem:[#allocation8 + $0x38] sm:$0xff]  ;;  %v648_v38 = vpack.c.bf16 %v95_v33, %v91_v32  ;;  %v94_v40 = vld [vmem:[#allocation8 + $0x20] sm:$0xff]  ;;  %v92_v41 = vld [vmem:[#allocation8 + $0x10] sm:$0xff] }
  0x72   :  { %v680_v42 = vpack.c.bf16 %v97_v35, %v93_v34  ;;  %v96_v43 = vld [vmem:[#allocation8 + $0x30] sm:$0xff]  ;;  %v99_v44 = vld [vmem:[#allocation8 + $0x48] sm:$0xff]  ;;  %v101_v46 = vld [vmem:[#allocation8 + $0x58] sm:$0xff]  ;;  %v650_v49 = vpack.c.bf16 %v94_v40, %v90_v39 }
  0x73   :  { %607 = vmatpush1.bf16.msra.mxu0 %v606_v12  ;;  %v103_v45 = vld [vmem:[#allocation8 + $0x68] sm:$0xff]  ;;  %v105_v47 = vld [vmem:[#allocation8 + $0x78] sm:$0xff]  ;;  %v154_v48 = vld [vmem:[#allocation5] sm:$0xff]  ;;  %v682_v50 = vpack.c.bf16 %v96_v43, %v92_v41 }
  0x74   :  { %639 = vmatpush1.bf16.msra.mxu1 %v638_v13  ;;  %609 = vmatprep.subr.bf16.mxu0 %v608_v14  ;;  %v652_v51 = vpack.c.bf16 %v103_v45, %v99_v44  ;;  %v98_v52 = vld [vmem:[#allocation8 + $0x40] sm:$0xff]  ;;  %v100_v54 = vld [vmem:[#allocation8 + $0x50] sm:$0xff]  ;;  %v684_v55 = vpack.c.bf16 %v105_v47, %v101_v46  ;;  %v107_v57 = vld [vmem:[#allocation8 + $0x88] sm:$0xff] }
  0x75   :  { %641 = vmatprep.subr.bf16.mxu1 %v640_v18  ;;  %v102_v53 = vld [vmem:[#allocation8 + $0x60] sm:$0xff]  ;;  %v104_v56 = vld [vmem:[#allocation8 + $0x70] sm:$0xff]  ;;  %v111_v58 = vld [vmem:[#allocation8 + $0xa8] sm:$0xff] }
  0x76   :  { %v109_v59 = vld [vmem:[#allocation8 + $0x98] sm:$0xff]  ;;  %v654_v61 = vpack.c.bf16 %v102_v53, %v98_v52  ;;  %v686_v62 = vpack.c.bf16 %v104_v56, %v100_v54  ;;  %v656_v63 = vpack.c.bf16 %v111_v58, %v107_v57  ;;  %v106_v1 = vld [vmem:[#allocation8 + $0x80] sm:$0xff]  ;;  %v108_v3 = vld [vmem:[#allocation8 + $0x90] sm:$0xff] }
  0x77   :  { %611 = vmatpush1.bf16.msra.mxu0 %v610_v24  ;;  %v113_v60 = vld [vmem:[#allocation8 + $0xb8] sm:$0xff]  ;;  %v110_v2 = vld [vmem:[#allocation8 + $0xa0] sm:$0xff]  ;;  %v112_v5 = vld [vmem:[#allocation8 + $0xb0] sm:$0xff] }
  0x78   :  { %643 = vmatpush1.bf16.msra.mxu1 %v642_v25  ;;  %613 = vmatprep.subr.bf16.mxu0 %v612_v26  ;;  %v688_v4 = vpack.c.bf16 %v113_v60, %v109_v59  ;;  %v115_v6 = vld [vmem:[#allocation8 + $0xc8] sm:$0xff]  ;;  %v117_v8 = vld [vmem:[#allocation8 + $0xd8] sm:$0xff]  ;;  %v658_v10 = vpack.c.bf16 %v110_v2, %v106_v1  ;;  %v690_v11 = vpack.c.bf16 %v112_v5, %v108_v3  ;;  %v114_v13 = vld [vmem:[#allocation8 + $0xc0] sm:$0xff]  ;;  %v505_v5 = vlaneseq }
  0x79   :  { %645 = vmatprep.subr.bf16.mxu1 %v644_v30  ;;  %v119_v7 = vld [vmem:[#allocation8 + $0xe8] sm:$0xff]  ;;  %v121_v9 = vld [vmem:[#allocation8 + $0xf8] sm:$0xff]  ;;  %v118_v14 = vld [vmem:[#allocation8 + $0xe0] sm:$0xff] }
  0x7a   :  { %v660_v12 = vpack.c.bf16 %v119_v7, %v115_v6  ;;  %v116_v15 = vld [vmem:[#allocation8 + $0xd0] sm:$0xff]  ;;  %v692_v16 = vpack.c.bf16 %v121_v9, %v117_v8  ;;  %v123_v18 = vld [vmem:[#allocation8 + $0x108] sm:$0xff]  ;;  %v125_v20 = vld [vmem:[#allocation8 + $0x118] sm:$0xff]  ;;  %v662_v22 = vpack.c.bf16 %v118_v14, %v114_v13  ;;  %v506_v6 = vshrl.u32 %v505_v5, 7 }
  0x7b   :  { %615 = vmatpush1.bf16.msra.mxu0 %v614_v36  ;;  %v120_v17 = vld [vmem:[#allocation8 + $0xf0] sm:$0xff]  ;;  %v127_v19 = vld [vmem:[#allocation8 + $0x128] sm:$0xff]  ;;  %v129_v21 = vld [vmem:[#allocation8 + $0x138] sm:$0xff] }
  0x7c   :  { %647 = vmatpush1.bf16.msra.mxu1 %v646_v37  ;;  %649 = vmatprep.subr.bf16.mxu0 %v648_v38  ;;  %v664_v23 = vpack.c.bf16 %v127_v19, %v123_v18  ;;  %v122_v24 = vld [vmem:[#allocation8 + $0x100] sm:$0xff]  ;;  %v124_v26 = vld [vmem:[#allocation8 + $0x110] sm:$0xff]  ;;  %v696_v27 = vpack.c.bf16 %v129_v21, %v125_v20  ;;  %v131_v29 = vld [vmem:[#allocation8 + $0x148] sm:$0xff]  ;;  %v515_v7 = vsub.s32 2, %v506_v6  ;;  %v511_v8 = vsub.s32 1, %v506_v6 }
  0x7d   :  { %681 = vmatprep.subr.bf16.mxu1 %v680_v42  ;;  %v126_v25 = vld [vmem:[#allocation8 + $0x120] sm:$0xff]  ;;  %v128_v28 = vld [vmem:[#allocation8 + $0x130] sm:$0xff]  ;;  %v135_v30 = vld [vmem:[#allocation8 + $0x168] sm:$0xff]  ;;  %v507_v20 = vsub.s32 0, %v506_v6 }
  0x7e   :  { %284 = vmatmul.mubr.f32.vlgmr.msra.gmra.mrb[0].mxu0 %v154_v48  ;;  %v133_v31 = vld [vmem:[#allocation8 + $0x158] sm:$0xff]  ;;  %v666_v33 = vpack.c.bf16 %v126_v25, %v122_v24  ;;  %v698_v34 = vpack.c.bf16 %v128_v28, %v124_v26  ;;  %v668_v35 = vpack.c.bf16 %v135_v30, %v131_v29  ;;  %v130_v36 = vld [vmem:[#allocation8 + $0x140] sm:$0xff]  ;;  %v132_v38 = vld [vmem:[#allocation8 + $0x150] sm:$0xff]  ;;  %v519_v26 = vsub.s32 3, %v506_v6 }
  0x7f   :  { %355 = vmatmul.mubr.f32.vlgmr.msra.gmra.mrb[0].mxu1 %v154_v48  ;;  %651 = vmatpush1.bf16.msra.mxu0 %v650_v49  ;;  %v137_v32 = vld [vmem:[#allocation8 + $0x178] sm:$0xff]  ;;  %v134_v37 = vld [vmem:[#allocation8 + $0x160] sm:$0xff]  ;;  %v136_v40 = vld [vmem:[#allocation8 + $0x170] sm:$0xff] }
  0x80   :  { %683 = vmatpush1.bf16.msra.mxu1 %v682_v50  ;;  %653 = vmatprep.subr.bf16.mxu0 %v652_v51  ;;  %v700_v39 = vpack.c.bf16 %v137_v32, %v133_v31  ;;  %v139_v41 = vld [vmem:[#allocation8 + $0x188] sm:$0xff]  ;;  %v141_v43 = vld [vmem:[#allocation8 + $0x198] sm:$0xff]  ;;  %v670_v45 = vpack.c.bf16 %v134_v37, %v130_v36  ;;  %v702_v46 = vpack.c.bf16 %v136_v40, %v132_v38  ;;  %v138_v48 = vld [vmem:[#allocation8 + $0x180] sm:$0xff] }
  0x81   :  { %685 = vmatprep.subr.bf16.mxu1 %v684_v55  ;;  %425 = vmatprep.mubr.f32.mxu0 %v911_v0  ;;  %v143_v42 = vld [vmem:[#allocation8 + $0x1a8] sm:$0xff]  ;;  %v145_v44 = vld [vmem:[#allocation8 + $0x1b8] sm:$0xff]  ;;  %v142_v49 = vld [vmem:[#allocation8 + $0x1a0] sm:$0xff] }
  0x82   :  { %496 = vmatprep.mubr.f32.mxu1 %v911_v0  ;;  %v694_v0 = vpack.c.bf16 %v120_v17, %v116_v15  ;;  %v672_v47 = vpack.c.bf16 %v143_v42, %v139_v41  ;;  %v140_v50 = vld [vmem:[#allocation8 + $0x190] sm:$0xff]  ;;  %v704_v51 = vpack.c.bf16 %v145_v44, %v141_v43  ;;  %v147_v53 = vld [vmem:[#allocation8 + $0x1c8] sm:$0xff]  ;;  %v149_v55 = vld [vmem:[#allocation8 + $0x1d8] sm:$0xff]  ;;  %v674_v57 = vpack.c.bf16 %v142_v49, %v138_v48 }
  0x83   :  { %655 = vmatpush1.bf16.msra.mxu0 %v654_v61  ;;  %v144_v52 = vld [vmem:[#allocation8 + $0x1b0] sm:$0xff]  ;;  %v151_v54 = vld [vmem:[#allocation8 + $0x1e8] sm:$0xff]  ;;  %v153_v56 = vld [vmem:[#allocation8 + $0x1f8] sm:$0xff] }
  0x84   :  { %687 = vmatpush1.bf16.msra.mxu1 %v686_v62  ;;  %657 = vmatprep.subr.bf16.mxu0 %v656_v63  ;;  %v706_v58 = vpack.c.bf16 %v144_v52, %v140_v50  ;;  %v676_v59 = vpack.c.bf16 %v151_v54, %v147_v53  ;;  %v146_v60 = vld [vmem:[#allocation8 + $0x1c0] sm:$0xff]  ;;  %v708_v62 = vpack.c.bf16 %v153_v56, %v149_v55  ;;  %v148_v63 = vld [vmem:[#allocation8 + $0x1d0] sm:$0xff]  ;;  %v503_v9 = vld [vmem:[%s1063_s5] sm:$0xf]  ;;  %s912_s5 = smov [#allocation12]  }
  0x85   :  { %689 = vmatprep.subr.bf16.mxu1 %v688_v4  ;;  %v150_v61 = vld [vmem:[#allocation8 + $0x1e0] sm:$0xff]  ;;  %v152_v1 = vld [vmem:[#allocation8 + $0x1f0] sm:$0xff]  ;;  %v89_v4 = vld [vmem:[#allocation2] sm:$0xff]  ;;  %v508_v21 = vrot.slane %v503_v9, %v507_v20  ;;  %s567_s23 = sshll.u32 %s912_s5, 4  ;;  %s568_s23 = int_to_ptr.vmem [resolvable:$true] %s567_s23 }
  0x86   :  { %v678_v2 = vpack.c.bf16 %v150_v61, %v146_v60  ;;  %v710_v3 = vpack.c.bf16 %v152_v1, %v148_v63  ;;  %v543_v28 = vld [vmem:[#allocation7] sm:$0xff]  ;;  %s850_s3 = scalar_lea.vmem %s568_s23, 128  ;;  %p855_p13 = scmp.lt.s32.totalorder %s568_s23, %s568_s23 }
  0x87   :  { %659 = vmatpush1.bf16.msra.mxu0 %v658_v10  ;;  %v516_v10 = vrot.slane %v503_v9, %v515_v7  ;;  %p851_p12 = scmp.ne.s32.totalorder %s568_s23, %s850_s3  ;;  %p856_p0 = scmp.lt.s32.totalorder %s850_s3, %s850_s3 }
  0x88   :  { %691 = vmatpush1.bf16.msra.mxu1 %v690_v11  ;;  %661 = vmatprep.subr.bf16.mxu0 %v660_v12  ;;  %v512_v11 = vrot.slane %v503_v9, %v511_v8 }
  0x89   :  { %693 = vmatprep.subr.bf16.mxu1 %v692_v16  ;;  %p857_p1 = por %p856_p0, %p855_p13 }
  0x8b   :  { %663 = vmatpush1.bf16.msra.mxu0 %v662_v22  ;;  %p858_p2 = pnand %p857_p1, %p851_p12 }
  0x8c   :  { %695 = vmatpush1.bf16.msra.mxu1 %v694_v0  ;;  %665 = vmatprep.subr.bf16.mxu0 %v664_v23 }
  0x8d   :  { %697 = vmatprep.subr.bf16.mxu1 %v696_v27  ;;  %v520_v27 = vrot.slane %v503_v9, %v519_v26 }
  0x8f   :  { %667 = vmatpush1.bf16.msra.mxu0 %v666_v33 }
  0x90   :  { %699 = vmatpush1.bf16.msra.mxu1 %v698_v34  ;;  %669 = vmatprep.subr.bf16.mxu0 %v668_v35 }
  0x91   :  { %701 = vmatprep.subr.bf16.mxu1 %v700_v39 }
  0x93   :  { %671 = vmatpush1.bf16.msra.mxu0 %v670_v45 }
  0x94   :  { %703 = vmatpush1.bf16.msra.mxu1 %v702_v46  ;;  %673 = vmatprep.subr.bf16.mxu0 %v672_v47 }
  0x95   :  { %705 = vmatprep.subr.bf16.mxu1 %v704_v51 }
  0x97   :  { %675 = vmatpush1.bf16.msra.mxu0 %v674_v57 }
  0x98   :  { %707 = vmatpush1.bf16.msra.mxu1 %v706_v58  ;;  %677 = vmatprep.subr.bf16.mxu0 %v676_v59 }
  0x99   :  { %709 = vmatprep.subr.bf16.mxu1 %v708_v62 }
  0x9b   :  { %679 = vmatpush1.bf16.msra.mxu0 %v678_v2 }
  0x9c   :  { %711 = vmatpush1.bf16.msra.mxu1 %v710_v3 }
  0x9e   :  { %426 = vmatmul.mubr.f32.vlgmr.msra.gmra.mrb[0].mxu0 %v89_v4 }
  0x9f   :  { %497 = vmatmul.mubr.f32.vlgmr.msra.gmra.mrb[0].mxu1 %v89_v4 }
 0x171   :  { %v427_v12 = vpop.f32.mrb[0].mxu0 }
 0x172   :  { %v498_v13 = vpop.f32.mrb[0].mxu1  ;;  %v429_v14 = vpop.f32.mrb[1].mxu0  ;;  %v525_v22 = vadd.f32 %v508_v21, %v427_v12 }
 0x173   :  { %v527_v15 = vadd.f32 %v516_v10, %v498_v13  ;;  %v526_v16 = vadd.f32 %v512_v11, %v429_v14  ;;  %v500_v17 = vpop.f32.mrb[1].mxu1 }
 0x174   :  { %v528_v33 = vadd.f32 %v520_v27, %v500_v17 }
 0x175   :  { %v583_v18 = vmul.f32 -1.442695, %v527_v15  ;;  %v582_v19 = vmul.f32 -1.442695, %v526_v16 }
 0x177   :  { %726 = vpow2.f32 %v583_v18 }
 0x178   :  { %728 = vpow2.f32 %v582_v19 }
 0x179   :  { %730 = vtanh.f32 %v525_v22 }
 0x181   :  { %v727_v0 = vpop.eup %726 }
 0x182   :  { %v729_v23 = vpop.eup %728  ;;  %v537_v24 = vadd.f32 1.0, %v727_v0 }
 0x183   :  { %v536_v25 = vadd.f32 1.0, %v729_v23  ;;  %v731_v29 = vpop.eup %730 }
 0x184   :  { %732 = vrcp.f32 %v537_v24 }
 0x185   :  { %734 = vrcp.f32 %v536_v25 }
 0x186   :  { %736 = vtanh.f32 %v528_v33 }
 0x18e   :  { %v733_v30 = vpop.eup %732 }
 0x18f   :  { %v735_v31 = vpop.eup %734  ;;  %v544_v32 = vmul.f32 %v733_v30, %v543_v28 }
 0x190   :  { %v545_v34 = vmul.f32 %v735_v31, %v731_v29 }
 0x192   :  { %v546_v35 = vadd.f32 %v545_v34, %v544_v32 }
 0x194   :  { %738 = vtanh.f32 %v546_v35  ;;  %550 = vst [vmem:[#allocation12] sm:$0xff] %v546_v35 }
 0x195   :  { %861 = shalt.err (!%p858_p2)
}
 0x196   :  { %s862_s16 = scalar_lea.hbm %s1065_s7, 128 }
 0x197   :  { %p863_p3 = scmp.ne.s32.totalorder %s1065_s7, %s862_s16  ;;  %p866_p4 = scmp.lt.u32.totalorder %s862_s16, %s1065_s7 }
 0x199   :  { %p868_p5 = pnand %p866_p4, %p863_p3 }
 0x19b   :  { %871 = shalt.err (!%p868_p5)
}
 0x19c   :  { %570 = dma.vmem_to_hbm [thread:$0]  %s568_s23, 128, %s1065_s7, [#allocation13]   ;;  %v737_v36 = vpop.eup %736 }
 0x19d   :  { %s913_s24 = smov [#allocation11]  }
 0x19e   :  { %s557_s0 = sshll.u32 %s913_s24, 4  ;;  %v739_v37 = vpop.eup %738  ;;  %s558_s0 = int_to_ptr.vmem [resolvable:$true] %s557_s0 }
 0x19f   :  { %v548_v38 = vmul.f32 %v739_v37, %v737_v36  ;;  %s872_s25 = scalar_lea.vmem %s558_s0, 128  ;;  %p877_p7 = scmp.lt.s32.totalorder %s558_s0, %s558_s0 }
 0x1a0   :  { %p873_p6 = scmp.ne.s32.totalorder %s558_s0, %s872_s25  ;;  %p878_p8 = scmp.lt.s32.totalorder %s872_s25, %s872_s25 }
 0x1a1   :  { %549 = vst [vmem:[#allocation11] sm:$0xff] %v548_v38 }
 0x1a2   :  { %p879_p9 = por %p878_p8, %p877_p7 }
 0x1a4   :  { %p880_p10 = pnand %p879_p9, %p873_p6 }
 0x1a6   :  { %883 = shalt.err (!%p880_p10)
}
 0x1a7   :  { %s884_s29 = scalar_lea.hbm %s1064_s6, 128 }
 0x1a8   :  { %p885_p11 = scmp.ne.s32.totalorder %s1064_s6, %s884_s29  ;;  %p888_p12 = scmp.lt.u32.totalorder %s884_s29, %s1064_s6 }
 0x1aa   :  { %p890_p13 = pnand %p888_p12, %p885_p11 }
 0x1ac   :  { %893 = shalt.err (!%p890_p13)
}
 0x1ad   :  { %560 = dma.vmem_to_hbm [thread:$0]  %s558_s0, 128, %s1064_s6, [#allocation4]  }
 0x1ae   :  { %900 = dma.done.wait [#allocation4], 128  }
 0x1af   :  { %901 = vsyncadd [#allocation4], 4294967168 }
 0x1b0   :  { %902 = dma.done.wait [#allocation13], 128  }
 0x1b1   :  { %903 = vsyncadd [#allocation13], 4294967168 }
 0x1b2   :  { %577 = vsyncpa [#allocation3], 1 }
 0x1b3   :  { %578 = vsyncpa [#allocation6], 1 }
 0x1b4   :  { %579 = vsyncpa [#allocation9], 1 }
 0x1b5   :  { %580 = vsyncpa [#allocation4], 1 }
 0x1b6   :  { %581 = vsyncpa [#allocation13], 1 }

// kernel: tpu_custom_call.1
= control target key start
LH: loop header
LB: loop body
LE: loop exit
PB: predicated region body
PF: predicated region fallthrough
CT: control target
= control target key end

     0   :  { %13 = vsyncpa [#allocation3], 0  ;;  %s1058_s0 = inlined_call_operand.hbm [shape: f32[8,128], index: 0, kind: input, shape index: {}]   ;;  %s1059_s1 = inlined_call_operand.hbm [shape: f32[8,128], index: 1, kind: input, shape index: {}]   ;;  %s1060_s2 = inlined_call_operand.hbm [shape: f32[8,128], index: 2, kind: input, shape index: {}]   ;;  %s1061_s3 = inlined_call_operand.hbm [shape: f32[128,512], index: 3, kind: input, shape index: {}]   ;;  %s1062_s4 = inlined_call_operand.hbm [shape: f32[128,512], index: 4, kind: input, shape index: {}]   ;;  %s1063_s5 = inlined_call_operand.vmem [shape: f32[1,512], index: 5, kind: input, shape index: {}]   ;;  %s1064_s6 = inlined_call_operand.hbm [shape: f32[8,128], index: 6, kind: output, shape index: {0}]   ;;  %s1065_s7 = inlined_call_operand.hbm [shape: f32[8,128], index: 7, kind: output, shape index: {1}]  }
   0x1   :  { %14 = vsyncpa [#allocation6], 0 }
   0x2   :  { %15 = vsyncpa [#allocation9], 0 }
   0x3   :  { %16 = vsyncpa [#allocation4], 0 }
   0x4   :  { %17 = vsyncpa [#allocation13], 0  ;;  %s904_s24 = smov [#allocation5]   ;;  %s905_s26 = smov [#allocation8]  }
   0x5   :  { %s34_s25 = sshll.u32 %s904_s24, 4  ;;  %s53_s27 = sshll.u32 %s905_s26, 4  ;;  %s35_s25 = int_to_ptr.vmem [resolvable:$true] %s34_s25  ;;  %s954_s27 = int_to_ptr.vmem [resolvable:$true] %s53_s27 }
   0x6   :  { %s740_s30 = scalar_lea.hbm %s1059_s1, 128 }
   0x7   :  { %p741_p0 = scmp.ne.s32.totalorder %s1059_s1, %s740_s30  ;;  %p744_p1 = scmp.lt.u32.totalorder %s740_s30, %s1059_s1 }
   0x9   :  { %p746_p2 = pnand %p744_p1, %p741_p0 }
   0xb   :  { %749 = shalt.err (!%p746_p2)
}
   0xc   :  { %s750_s12 = scalar_lea.vmem %s35_s25, 128  ;;  %p755_p4 = scmp.lt.s32.totalorder %s35_s25, %s35_s25 }
   0xd   :  { %p751_p3 = scmp.ne.s32.totalorder %s35_s25, %s750_s12  ;;  %p756_p5 = scmp.lt.s32.totalorder %s750_s12, %s750_s12 }
   0xf   :  { %p757_p6 = por %p756_p5, %p755_p4 }
  0x11   :  { %p758_p7 = pnand %p757_p6, %p751_p3 }
  0x13   :  { %761 = shalt.err (!%p758_p7)
}
  0x14   :  { %37 = dma.hbm_to_vmem [thread:$0]  %s1059_s1, 128, %s35_s25, [#allocation6]  }
  0x15   :  { %s762_s17 = scalar_lea.hbm %s1061_s3, 8192 }
  0x16   :  { %p763_p8 = scmp.ne.s32.totalorder %s1061_s3, %s762_s17  ;;  %p766_p9 = scmp.lt.u32.totalorder %s762_s17, %s1061_s3 }
  0x18   :  { %p768_p10 = pnand %p766_p9, %p763_p8 }
  0x1a   :  { %771 = shalt.err (!%p768_p10)
}
  0x1b   :  { %s772_s22 = scalar_lea.vmem %s954_s27, 8192  ;;  %p777_p12 = scmp.lt.s32.totalorder %s954_s27, %s954_s27 }
  0x1c   :  { %p773_p11 = scmp.ne.s32.totalorder %s954_s27, %s772_s22  ;;  %p778_p13 = scmp.lt.s32.totalorder %s772_s22, %s772_s22 }
  0x1e   :  { %p779_p0 = por %p778_p13, %p777_p12 }
  0x20   :  { %p780_p1 = pnand %p779_p0, %p773_p11 }
  0x22   :  { %783 = shalt.err (!%p780_p1)
}
  0x23   :  { %s906_s1 = smov 512   ;;  %s907_s23 = smov 32  }
  0x24   :  { %59 = dma.hbm_to_vmem [thread:$0]  %s1061_s3, 8192, %s954_s27, [#allocation9], %s906_s1, %s906_s1, %s907_s23  }
  0x25   :  { %s908_s26 = smov [#allocation2]   ;;  %s909_s29 = smov [#allocation7]  }
  0x26   :  { %s24_s28 = sshll.u32 %s908_s26, 4  ;;  %s44_s30 = sshll.u32 %s909_s29, 4  ;;  %s25_s28 = int_to_ptr.vmem [resolvable:$true] %s24_s28  ;;  %s45_s30 = int_to_ptr.vmem [resolvable:$true] %s44_s30 }
  0x27   :  { %s784_s10 = scalar_lea.hbm %s1058_s0, 128 }
  0x28   :  { %p785_p2 = scmp.ne.s32.totalorder %s1058_s0, %s784_s10  ;;  %p788_p3 = scmp.lt.u32.totalorder %s784_s10, %s1058_s0 }
  0x2a   :  { %p790_p4 = pnand %p788_p3, %p785_p2 }
  0x2c   :  { %793 = shalt.err (!%p790_p4)
}
  0x2d   :  { %s794_s3 = scalar_lea.vmem %s25_s28, 128  ;;  %p799_p6 = scmp.lt.s32.totalorder %s25_s28, %s25_s28 }
  0x2e   :  { %p795_p5 = scmp.ne.s32.totalorder %s25_s28, %s794_s3  ;;  %p800_p7 = scmp.lt.s32.totalorder %s794_s3, %s794_s3 }
  0x30   :  { %p801_p8 = por %p800_p7, %p799_p6 }
  0x32   :  { %p802_p9 = pnand %p801_p8, %p795_p5 }
  0x34   :  { %805 = shalt.err (!%p802_p9)
}
  0x35   :  { %27 = dma.hbm_to_vmem [thread:$0]  %s1058_s0, 128, %s25_s28, [#allocation3]  }
  0x36   :  { %s806_s18 = scalar_lea.hbm %s1060_s2, 128 }
  0x37   :  { %p807_p10 = scmp.ne.s32.totalorder %s1060_s2, %s806_s18  ;;  %p810_p11 = scmp.lt.u32.totalorder %s806_s18, %s1060_s2 }
  0x39   :  { %p812_p12 = pnand %p810_p11, %p807_p10 }
  0x3b   :  { %815 = shalt.err (!%p812_p12)
}
  0x3c   :  { %s816_s24 = scalar_lea.vmem %s45_s30, 128  ;;  %p821_p0 = scmp.lt.s32.totalorder %s45_s30, %s45_s30 }
  0x3d   :  { %p817_p13 = scmp.ne.s32.totalorder %s45_s30, %s816_s24  ;;  %p822_p1 = scmp.lt.s32.totalorder %s816_s24, %s816_s24 }
  0x3f   :  { %p823_p2 = por %p822_p1, %p821_p0 }
  0x41   :  { %p824_p3 = pnand %p823_p2, %p817_p13 }
  0x43   :  { %827 = shalt.err (!%p824_p3)
}
  0x44   :  { %47 = dma.hbm_to_vmem [thread:$0]  %s1060_s2, 128, %s45_s30, [#allocation6]  }
  0x45   :  { %s910_s26 = smov [#allocation10]   ;;  %s828_s9 = scalar_lea.hbm %s1062_s4, 8192 }
  0x46   :  { %s65_s28 = sshll.u32 %s910_s26, 4  ;;  %p829_p4 = scmp.ne.s32.totalorder %s1062_s4, %s828_s9  ;;  %s66_s28 = int_to_ptr.vmem [resolvable:$true] %s65_s28 }
  0x47   :  { %p832_p5 = scmp.lt.u32.totalorder %s828_s9, %s1062_s4 }
  0x49   :  { %p834_p6 = pnand %p832_p5, %p829_p4 }
  0x4b   :  { %837 = shalt.err (!%p834_p6)
}
  0x4c   :  { %s838_s14 = scalar_lea.vmem %s66_s28, 8192  ;;  %p843_p8 = scmp.lt.s32.totalorder %s66_s28, %s66_s28 }
  0x4d   :  { %p839_p7 = scmp.ne.s32.totalorder %s66_s28, %s838_s14  ;;  %p844_p9 = scmp.lt.s32.totalorder %s838_s14, %s838_s14 }
  0x4f   :  { %p845_p10 = por %p844_p9, %p843_p8 }
  0x51   :  { %p846_p11 = pnand %p845_p10, %p839_p7 }
  0x53   :  { %849 = shalt.err (!%p846_p11)
}
  0x54   :  { %71 = dma.hbm_to_vmem [thread:$0]  %s1062_s4, 8192, %s66_s28, [#allocation9], %s906_s1, %s906_s1, %s907_s23  }
  0x55   :  { %894 = dma.done.wait [#allocation3], 128  }
  0x56   :  { %895 = vsyncadd [#allocation3], 4294967168 }
  0x57   :  { %896 = dma.done.wait [#allocation6], 256  }
  0x58   :  { %897 = vsyncadd [#allocation6], 4294967040 }
  0x59   :  { %898 = dma.done.wait [#allocation9], 16384  }
  0x5a   :  { %899 = vsyncadd [#allocation9], 4294950912  ;;  %v911_v0 = vmov 0.0   ;;  %v156_v1 = vld [vmem:[#allocation10 + $0x8] sm:$0xff]  ;;  %v158_v3 = vld [vmem:[#allocation10 + $0x18] sm:$0xff] }
  0x5b   :  { %283 = vmatprep.mubr.f32.mxu0 %v911_v0  ;;  %354 = vmatprep.mubr.f32.mxu1 %v911_v0  ;;  %v160_v2 = vld [vmem:[#allocation10 + $0x28] sm:$0xff]  ;;  %v162_v5 = vld [vmem:[#allocation10 + $0x38] sm:$0xff]  ;;  %v155_v6 = vld [vmem:[#allocation10] sm:$0xff] }
  0x5c   :  { %v584_v4 = vpack.c.bf16 %v160_v2, %v156_v1  ;;  %v159_v7 = vld [vmem:[#allocation10 + $0x20] sm:$0xff]  ;;  %v616_v8 = vpack.c.bf16 %v162_v5, %v158_v3  ;;  %v157_v10 = vld [vmem:[#allocation10 + $0x10] sm:$0xff]  ;;  %v164_v12 = vld [vmem:[#allocation10 + $0x48] sm:$0xff] }
  0x5d   :  { %v586_v9 = vpack.c.bf16 %v159_v7, %v155_v6  ;;  %v161_v11 = vld [vmem:[#allocation10 + $0x30] sm:$0xff]  ;;  %v168_v14 = vld [vmem:[#allocation10 + $0x68] sm:$0xff]  ;;  %v166_v15 = vld [vmem:[#allocation10 + $0x58] sm:$0xff] }
  0x5e   :  { %585 = vmatprep.subr.bf16.mxu0 %v584_v4  ;;  %v618_v13 = vpack.c.bf16 %v161_v11, %v157_v10  ;;  %v170_v16 = vld [vmem:[#allocation10 + $0x78] sm:$0xff]  ;;  %617 = vmatprep.subr.bf16.mxu1 %v616_v8  ;;  %v588_v17 = vpack.c.bf16 %v168_v14, %v164_v12  ;;  %v163_v19 = vld [vmem:[#allocation10 + $0x40] sm:$0xff]  ;;  %v165_v21 = vld [vmem:[#allocation10 + $0x50] sm:$0xff] }
  0x5f   :  { %587 = vmatpush1.bf16.msra.mxu0 %v586_v9  ;;  %v620_v18 = vpack.c.bf16 %v170_v16, %v166_v15  ;;  %v167_v20 = vld [vmem:[#allocation10 + $0x60] sm:$0xff]  ;;  %v169_v23 = vld [vmem:[#allocation10 + $0x70] sm:$0xff]  ;;  %v172_v24 = vld [vmem:[#allocation10 + $0x88] sm:$0xff] }
  0x60   :  { %619 = vmatpush1.bf16.msra.mxu1 %v618_v13  ;;  %v590_v22 = vpack.c.bf16 %v167_v20, %v163_v19  ;;  %v176_v25 = vld [vmem:[#allocation10 + $0xa8] sm:$0xff]  ;;  %589 = vmatprep.subr.bf16.mxu0 %v588_v17  ;;  %v622_v26 = vpack.c.bf16 %v169_v23, %v165_v21  ;;  %v174_v28 = vld [vmem:[#allocation10 + $0x98] sm:$0xff]  ;;  %v171_v30 = vld [vmem:[#allocation10 + $0x80] sm:$0xff] }
  0x61   :  { %621 = vmatprep.subr.bf16.mxu1 %v620_v18  ;;  %v592_v27 = vpack.c.bf16 %v176_v25, %v172_v24  ;;  %v178_v29 = vld [vmem:[#allocation10 + $0xb8] sm:$0xff]  ;;  %v175_v32 = vld [vmem:[#allocation10 + $0xa0] sm:$0xff]  ;;  %v173_v33 = vld [vmem:[#allocation10 + $0x90] sm:$0xff] }
  0x62   :  { %v624_v31 = vpack.c.bf16 %v178_v29, %v174_v28  ;;  %v177_v34 = vld [vmem:[#allocation10 + $0xb0] sm:$0xff]  ;;  %v594_v35 = vpack.c.bf16 %v175_v32, %v171_v30  ;;  %v180_v36 = vld [vmem:[#allocation10 + $0xc8] sm:$0xff]  ;;  %v182_v38 = vld [vmem:[#allocation10 + $0xd8] sm:$0xff] }
  0x63   :  { %591 = vmatpush1.bf16.msra.mxu0 %v590_v22  ;;  %v184_v37 = vld [vmem:[#allocation10 + $0xe8] sm:$0xff]  ;;  %v626_v39 = vpack.c.bf16 %v177_v34, %v173_v33  ;;  %v186_v41 = vld [vmem:[#allocation10 + $0xf8] sm:$0xff]  ;;  %v179_v42 = vld [vmem:[#allocation10 + $0xc0] sm:$0xff] }
  0x64   :  { %623 = vmatpush1.bf16.msra.mxu1 %v622_v26  ;;  %593 = vmatprep.subr.bf16.mxu0 %v592_v27  ;;  %v596_v40 = vpack.c.bf16 %v184_v37, %v180_v36  ;;  %v183_v43 = vld [vmem:[#allocation10 + $0xe0] sm:$0xff]  ;;  %v628_v44 = vpack.c.bf16 %v186_v41, %v182_v38  ;;  %v181_v45 = vld [vmem:[#allocation10 + $0xd0] sm:$0xff]  ;;  %v188_v47 = vld [vmem:[#allocation10 + $0x108] sm:$0xff] }
  0x65   :  { %625 = vmatprep.subr.bf16.mxu1 %v624_v31  ;;  %v185_v46 = vld [vmem:[#allocation10 + $0xf0] sm:$0xff]  ;;  %v192_v48 = vld [vmem:[#allocation10 + $0x128] sm:$0xff]  ;;  %v190_v49 = vld [vmem:[#allocation10 + $0x118] sm:$0xff]  ;;  %v598_v51 = vpack.c.bf16 %v183_v43, %v179_v42 }
  0x66   :  { %v194_v50 = vld [vmem:[#allocation10 + $0x138] sm:$0xff]  ;;  %v630_v52 = vpack.c.bf16 %v185_v46, %v181_v45  ;;  %v600_v53 = vpack.c.bf16 %v192_v48, %v188_v47  ;;  %v187_v54 = vld [vmem:[#allocation10 + $0x100] sm:$0xff]  ;;  %v189_v56 = vld [vmem:[#allocation10 + $0x110] sm:$0xff] }
  0x67   :  { %595 = vmatpush1.bf16.msra.mxu0 %v594_v35  ;;  %v191_v55 = vld [vmem:[#allocation10 + $0x120] sm:$0xff]  ;;  %v632_v57 = vpack.c.bf16 %v194_v50, %v190_v49  ;;  %v193_v58 = vld [vmem:[#allocation10 + $0x130] sm:$0xff]  ;;  %v196_v59 = vld [vmem:[#allocation10 + $0x148] sm:$0xff] }
  0x68   :  { %627 = vmatpush1.bf16.msra.mxu1 %v626_v39  ;;  %597 = vmatprep.subr.bf16.mxu0 %v596_v40  ;;  %v200_v60 = vld [vmem:[#allocation10 + $0x168] sm:$0xff]  ;;  %v198_v61 = vld [vmem:[#allocation10 + $0x158] sm:$0xff]  ;;  %v602_v63 = vpack.c.bf16 %v191_v55, %v187_v54  ;;  %v634_v1 = vpack.c.bf16 %v193_v58, %v189_v56  ;;  %v195_v3 = vld [vmem:[#allocation10 + $0x140] sm:$0xff] }
  0x69   :  { %629 = vmatprep.subr.bf16.mxu1 %v628_v44  ;;  %v202_v62 = vld [vmem:[#allocation10 + $0x178] sm:$0xff]  ;;  %v604_v2 = vpack.c.bf16 %v200_v60, %v196_v59  ;;  %v199_v4 = vld [vmem:[#allocation10 + $0x160] sm:$0xff]  ;;  %v197_v5 = vld [vmem:[#allocation10 + $0x150] sm:$0xff] }
  0x6a   :  { %v636_v6 = vpack.c.bf16 %v202_v62, %v198_v61  ;;  %v201_v7 = vld [vmem:[#allocation10 + $0x170] sm:$0xff]  ;;  %v204_v8 = vld [vmem:[#allocation10 + $0x188] sm:$0xff]  ;;  %v206_v10 = vld [vmem:[#allocation10 + $0x198] sm:$0xff]  ;;  %v606_v12 = vpack.c.bf16 %v199_v4, %v195_v3 }
  0x6b   :  { %599 = vmatpush1.bf16.msra.mxu0 %v598_v51  ;;  %v208_v9 = vld [vmem:[#allocation10 + $0x1a8] sm:$0xff]  ;;  %v210_v11 = vld [vmem:[#allocation10 + $0x1b8] sm:$0xff]  ;;  %v638_v13 = vpack.c.bf16 %v201_v7, %v197_v5  ;;  %v203_v15 = vld [vmem:[#allocation10 + $0x180] sm:$0xff] }
  0x6c   :  { %631 = vmatpush1.bf16.msra.mxu1 %v630_v52  ;;  %601 = vmatprep.subr.bf16.mxu0 %v600_v53  ;;  %v608_v14 = vpack.c.bf16 %v208_v9, %v204_v8  ;;  %v207_v16 = vld [vmem:[#allocation10 + $0x1a0] sm:$0xff]  ;;  %v205_v17 = vld [vmem:[#allocation10 + $0x190] sm:$0xff]  ;;  %v640_v18 = vpack.c.bf16 %v210_v11, %v206_v10  ;;  %v212_v20 = vld [vmem:[#allocation10 + $0x1c8] sm:$0xff] }
  0x6d   :  { %633 = vmatprep.subr.bf16.mxu1 %v632_v57  ;;  %v209_v19 = vld [vmem:[#allocation10 + $0x1b0] sm:$0xff]  ;;  %v216_v21 = vld [vmem:[#allocation10 + $0x1e8] sm:$0xff]  ;;  %v214_v22 = vld [vmem:[#allocation10 + $0x1d8] sm:$0xff]  ;;  %v610_v24 = vpack.c.bf16 %v207_v16, %v203_v15 }
  0x6e   :  { %v218_v23 = vld [vmem:[#allocation10 + $0x1f8] sm:$0xff]  ;;  %v642_v25 = vpack.c.bf16 %v209_v19, %v205_v17  ;;  %v612_v26 = vpack.c.bf16 %v216_v21, %v212_v20  ;;  %v211_v27 = vld [vmem:[#allocation10 + $0x1c0] sm:$0xff]  ;;  %v213_v29 = vld [vmem:[#allocation10 + $0x1d0] sm:$0xff] }
  0x6f   :  { %603 = vmatpush1.bf16.msra.mxu0 %v602_v63  ;;  %v215_v28 = vld [vmem:[#allocation10 + $0x1e0] sm:$0xff]  ;;  %v644_v30 = vpack.c.bf16 %v218_v23, %v214_v22  ;;  %v217_v31 = vld [vmem:[#allocation10 + $0x1f0] sm:$0xff]  ;;  %v91_v32 = vld [vmem:[#allocation8 + $0x8] sm:$0xff] }
  0x70   :  { %635 = vmatpush1.bf16.msra.mxu1 %v634_v1  ;;  %605 = vmatprep.subr.bf16.mxu0 %v604_v2  ;;  %v95_v33 = vld [vmem:[#allocation8 + $0x28] sm:$0xff]  ;;  %v93_v34 = vld [vmem:[#allocation8 + $0x18] sm:$0xff]  ;;  %v614_v36 = vpack.c.bf16 %v215_v28, %v211_v27  ;;  %v646_v37 = vpack.c.bf16 %v217_v31, %v213_v29  ;;  %v90_v39 = vld [vmem:[#allocation8] sm:$0xff] }
  0x71   :  { %637 = vmatprep.subr.bf16.mxu1 %v636_v6  ;;  %v97_v35 = vld [vmem:[#allocation8 + $0x38] sm:$0xff]  ;;  %v648_v38 = vpack.c.bf16 %v95_v33, %v91_v32  ;;  %v94_v40 = vld [vmem:[#allocation8 + $0x20] sm:$0xff]  ;;  %v92_v41 = vld [vmem:[#allocation8 + $0x10] sm:$0xff] }
  0x72   :  { %v680_v42 = vpack.c.bf16 %v97_v35, %v93_v34  ;;  %v96_v43 = vld [vmem:[#allocation8 + $0x30] sm:$0xff]  ;;  %v99_v44 = vld [vmem:[#allocation8 + $0x48] sm:$0xff]  ;;  %v101_v46 = vld [vmem:[#allocation8 + $0x58] sm:$0xff]  ;;  %v650_v49 = vpack.c.bf16 %v94_v40, %v90_v39 }
  0x73   :  { %607 = vmatpush1.bf16.msra.mxu0 %v606_v12  ;;  %v103_v45 = vld [vmem:[#allocation8 + $0x68] sm:$0xff]  ;;  %v105_v47 = vld [vmem:[#allocation8 + $0x78] sm:$0xff]  ;;  %v154_v48 = vld [vmem:[#allocation5] sm:$0xff]  ;;  %v682_v50 = vpack.c.bf16 %v96_v43, %v92_v41 }
  0x74   :  { %639 = vmatpush1.bf16.msra.mxu1 %v638_v13  ;;  %609 = vmatprep.subr.bf16.mxu0 %v608_v14  ;;  %v652_v51 = vpack.c.bf16 %v103_v45, %v99_v44  ;;  %v98_v52 = vld [vmem:[#allocation8 + $0x40] sm:$0xff]  ;;  %v100_v54 = vld [vmem:[#allocation8 + $0x50] sm:$0xff]  ;;  %v684_v55 = vpack.c.bf16 %v105_v47, %v101_v46  ;;  %v107_v57 = vld [vmem:[#allocation8 + $0x88] sm:$0xff] }
  0x75   :  { %641 = vmatprep.subr.bf16.mxu1 %v640_v18  ;;  %v102_v53 = vld [vmem:[#allocation8 + $0x60] sm:$0xff]  ;;  %v104_v56 = vld [vmem:[#allocation8 + $0x70] sm:$0xff]  ;;  %v111_v58 = vld [vmem:[#allocation8 + $0xa8] sm:$0xff] }
  0x76   :  { %v109_v59 = vld [vmem:[#allocation8 + $0x98] sm:$0xff]  ;;  %v654_v61 = vpack.c.bf16 %v102_v53, %v98_v52  ;;  %v686_v62 = vpack.c.bf16 %v104_v56, %v100_v54  ;;  %v656_v63 = vpack.c.bf16 %v111_v58, %v107_v57  ;;  %v106_v1 = vld [vmem:[#allocation8 + $0x80] sm:$0xff]  ;;  %v108_v3 = vld [vmem:[#allocation8 + $0x90] sm:$0xff] }
  0x77   :  { %611 = vmatpush1.bf16.msra.mxu0 %v610_v24  ;;  %v113_v60 = vld [vmem:[#allocation8 + $0xb8] sm:$0xff]  ;;  %v110_v2 = vld [vmem:[#allocation8 + $0xa0] sm:$0xff]  ;;  %v112_v5 = vld [vmem:[#allocation8 + $0xb0] sm:$0xff] }
  0x78   :  { %643 = vmatpush1.bf16.msra.mxu1 %v642_v25  ;;  %613 = vmatprep.subr.bf16.mxu0 %v612_v26  ;;  %v688_v4 = vpack.c.bf16 %v113_v60, %v109_v59  ;;  %v115_v6 = vld [vmem:[#allocation8 + $0xc8] sm:$0xff]  ;;  %v117_v8 = vld [vmem:[#allocation8 + $0xd8] sm:$0xff]  ;;  %v658_v10 = vpack.c.bf16 %v110_v2, %v106_v1  ;;  %v690_v11 = vpack.c.bf16 %v112_v5, %v108_v3  ;;  %v114_v13 = vld [vmem:[#allocation8 + $0xc0] sm:$0xff]  ;;  %v505_v5 = vlaneseq }
  0x79   :  { %645 = vmatprep.subr.bf16.mxu1 %v644_v30  ;;  %v119_v7 = vld [vmem:[#allocation8 + $0xe8] sm:$0xff]  ;;  %v121_v9 = vld [vmem:[#allocation8 + $0xf8] sm:$0xff]  ;;  %v118_v14 = vld [vmem:[#allocation8 + $0xe0] sm:$0xff] }
  0x7a   :  { %v660_v12 = vpack.c.bf16 %v119_v7, %v115_v6  ;;  %v116_v15 = vld [vmem:[#allocation8 + $0xd0] sm:$0xff]  ;;  %v692_v16 = vpack.c.bf16 %v121_v9, %v117_v8  ;;  %v123_v18 = vld [vmem:[#allocation8 + $0x108] sm:$0xff]  ;;  %v125_v20 = vld [vmem:[#allocation8 + $0x118] sm:$0xff]  ;;  %v662_v22 = vpack.c.bf16 %v118_v14, %v114_v13  ;;  %v506_v6 = vshrl.u32 %v505_v5, 7 }
  0x7b   :  { %615 = vmatpush1.bf16.msra.mxu0 %v614_v36  ;;  %v120_v17 = vld [vmem:[#allocation8 + $0xf0] sm:$0xff]  ;;  %v127_v19 = vld [vmem:[#allocation8 + $0x128] sm:$0xff]  ;;  %v129_v21 = vld [vmem:[#allocation8 + $0x138] sm:$0xff] }
  0x7c   :  { %647 = vmatpush1.bf16.msra.mxu1 %v646_v37  ;;  %649 = vmatprep.subr.bf16.mxu0 %v648_v38  ;;  %v664_v23 = vpack.c.bf16 %v127_v19, %v123_v18  ;;  %v122_v24 = vld [vmem:[#allocation8 + $0x100] sm:$0xff]  ;;  %v124_v26 = vld [vmem:[#allocation8 + $0x110] sm:$0xff]  ;;  %v696_v27 = vpack.c.bf16 %v129_v21, %v125_v20  ;;  %v131_v29 = vld [vmem:[#allocation8 + $0x148] sm:$0xff]  ;;  %v515_v7 = vsub.s32 2, %v506_v6  ;;  %v511_v8 = vsub.s32 1, %v506_v6 }
  0x7d   :  { %681 = vmatprep.subr.bf16.mxu1 %v680_v42  ;;  %v126_v25 = vld [vmem:[#allocation8 + $0x120] sm:$0xff]  ;;  %v128_v28 = vld [vmem:[#allocation8 + $0x130] sm:$0xff]  ;;  %v135_v30 = vld [vmem:[#allocation8 + $0x168] sm:$0xff]  ;;  %v507_v20 = vsub.s32 0, %v506_v6 }
  0x7e   :  { %284 = vmatmul.mubr.f32.vlgmr.msra.gmra.mrb[0].mxu0 %v154_v48  ;;  %v133_v31 = vld [vmem:[#allocation8 + $0x158] sm:$0xff]  ;;  %v666_v33 = vpack.c.bf16 %v126_v25, %v122_v24  ;;  %v698_v34 = vpack.c.bf16 %v128_v28, %v124_v26  ;;  %v668_v35 = vpack.c.bf16 %v135_v30, %v131_v29  ;;  %v130_v36 = vld [vmem:[#allocation8 + $0x140] sm:$0xff]  ;;  %v132_v38 = vld [vmem:[#allocation8 + $0x150] sm:$0xff]  ;;  %v519_v26 = vsub.s32 3, %v506_v6 }
  0x7f   :  { %355 = vmatmul.mubr.f32.vlgmr.msra.gmra.mrb[0].mxu1 %v154_v48  ;;  %651 = vmatpush1.bf16.msra.mxu0 %v650_v49  ;;  %v137_v32 = vld [vmem:[#allocation8 + $0x178] sm:$0xff]  ;;  %v134_v37 = vld [vmem:[#allocation8 + $0x160] sm:$0xff]  ;;  %v136_v40 = vld [vmem:[#allocation8 + $0x170] sm:$0xff] }
  0x80   :  { %683 = vmatpush1.bf16.msra.mxu1 %v682_v50  ;;  %653 = vmatprep.subr.bf16.mxu0 %v652_v51  ;;  %v700_v39 = vpack.c.bf16 %v137_v32, %v133_v31  ;;  %v139_v41 = vld [vmem:[#allocation8 + $0x188] sm:$0xff]  ;;  %v141_v43 = vld [vmem:[#allocation8 + $0x198] sm:$0xff]  ;;  %v670_v45 = vpack.c.bf16 %v134_v37, %v130_v36  ;;  %v702_v46 = vpack.c.bf16 %v136_v40, %v132_v38  ;;  %v138_v48 = vld [vmem:[#allocation8 + $0x180] sm:$0xff] }
  0x81   :  { %685 = vmatprep.subr.bf16.mxu1 %v684_v55  ;;  %425 = vmatprep.mubr.f32.mxu0 %v911_v0  ;;  %v143_v42 = vld [vmem:[#allocation8 + $0x1a8] sm:$0xff]  ;;  %v145_v44 = vld [vmem:[#allocation8 + $0x1b8] sm:$0xff]  ;;  %v142_v49 = vld [vmem:[#allocation8 + $0x1a0] sm:$0xff] }
  0x82   :  { %496 = vmatprep.mubr.f32.mxu1 %v911_v0  ;;  %v694_v0 = vpack.c.bf16 %v120_v17, %v116_v15  ;;  %v672_v47 = vpack.c.bf16 %v143_v42, %v139_v41  ;;  %v140_v50 = vld [vmem:[#allocation8 + $0x190] sm:$0xff]  ;;  %v704_v51 = vpack.c.bf16 %v145_v44, %v141_v43  ;;  %v147_v53 = vld [vmem:[#allocation8 + $0x1c8] sm:$0xff]  ;;  %v149_v55 = vld [vmem:[#allocation8 + $0x1d8] sm:$0xff]  ;;  %v674_v57 = vpack.c.bf16 %v142_v49, %v138_v48 }
  0x83   :  { %655 = vmatpush1.bf16.msra.mxu0 %v654_v61  ;;  %v144_v52 = vld [vmem:[#allocation8 + $0x1b0] sm:$0xff]  ;;  %v151_v54 = vld [vmem:[#allocation8 + $0x1e8] sm:$0xff]  ;;  %v153_v56 = vld [vmem:[#allocation8 + $0x1f8] sm:$0xff] }
  0x84   :  { %687 = vmatpush1.bf16.msra.mxu1 %v686_v62  ;;  %657 = vmatprep.subr.bf16.mxu0 %v656_v63  ;;  %v706_v58 = vpack.c.bf16 %v144_v52, %v140_v50  ;;  %v676_v59 = vpack.c.bf16 %v151_v54, %v147_v53  ;;  %v146_v60 = vld [vmem:[#allocation8 + $0x1c0] sm:$0xff]  ;;  %v708_v62 = vpack.c.bf16 %v153_v56, %v149_v55  ;;  %v148_v63 = vld [vmem:[#allocation8 + $0x1d0] sm:$0xff]  ;;  %v503_v9 = vld [vmem:[%s1063_s5] sm:$0xf]  ;;  %s912_s5 = smov [#allocation12]  }
  0x85   :  { %689 = vmatprep.subr.bf16.mxu1 %v688_v4  ;;  %v150_v61 = vld [vmem:[#allocation8 + $0x1e0] sm:$0xff]  ;;  %v152_v1 = vld [vmem:[#allocation8 + $0x1f0] sm:$0xff]  ;;  %v89_v4 = vld [vmem:[#allocation2] sm:$0xff]  ;;  %v508_v21 = vrot.slane %v503_v9, %v507_v20  ;;  %s567_s23 = sshll.u32 %s912_s5, 4  ;;  %s568_s23 = int_to_ptr.vmem [resolvable:$true] %s567_s23 }
  0x86   :  { %v678_v2 = vpack.c.bf16 %v150_v61, %v146_v60  ;;  %v710_v3 = vpack.c.bf16 %v152_v1, %v148_v63  ;;  %v543_v28 = vld [vmem:[#allocation7] sm:$0xff]  ;;  %s850_s3 = scalar_lea.vmem %s568_s23, 128  ;;  %p855_p13 = scmp.lt.s32.totalorder %s568_s23, %s568_s23 }
  0x87   :  { %659 = vmatpush1.bf16.msra.mxu0 %v658_v10  ;;  %v516_v10 = vrot.slane %v503_v9, %v515_v7  ;;  %p851_p12 = scmp.ne.s32.totalorder %s568_s23, %s850_s3  ;;  %p856_p0 = scmp.lt.s32.totalorder %s850_s3, %s850_s3 }
  0x88   :  { %691 = vmatpush1.bf16.msra.mxu1 %v690_v11  ;;  %661 = vmatprep.subr.bf16.mxu0 %v660_v12  ;;  %v512_v11 = vrot.slane %v503_v9, %v511_v8 }
  0x89   :  { %693 = vmatprep.subr.bf16.mxu1 %v692_v16  ;;  %p857_p1 = por %p856_p0, %p855_p13 }
  0x8b   :  { %663 = vmatpush1.bf16.msra.mxu0 %v662_v22  ;;  %p858_p2 = pnand %p857_p1, %p851_p12 }
  0x8c   :  { %695 = vmatpush1.bf16.msra.mxu1 %v694_v0  ;;  %665 = vmatprep.subr.bf16.mxu0 %v664_v23 }
  0x8d   :  { %697 = vmatprep.subr.bf16.mxu1 %v696_v27  ;;  %v520_v27 = vrot.slane %v503_v9, %v519_v26 }
  0x8f   :  { %667 = vmatpush1.bf16.msra.mxu0 %v666_v33 }
  0x90   :  { %699 = vmatpush1.bf16.msra.mxu1 %v698_v34  ;;  %669 = vmatprep.subr.bf16.mxu0 %v668_v35 }
  0x91   :  { %701 = vmatprep.subr.bf16.mxu1 %v700_v39 }
  0x93   :  { %671 = vmatpush1.bf16.msra.mxu0 %v670_v45 }
  0x94   :  { %703 = vmatpush1.bf16.msra.mxu1 %v702_v46  ;;  %673 = vmatprep.subr.bf16.mxu0 %v672_v47 }
  0x95   :  { %705 = vmatprep.subr.bf16.mxu1 %v704_v51 }
  0x97   :  { %675 = vmatpush1.bf16.msra.mxu0 %v674_v57 }
  0x98   :  { %707 = vmatpush1.bf16.msra.mxu1 %v706_v58  ;;  %677 = vmatprep.subr.bf16.mxu0 %v676_v59 }
  0x99   :  { %709 = vmatprep.subr.bf16.mxu1 %v708_v62 }
  0x9b   :  { %679 = vmatpush1.bf16.msra.mxu0 %v678_v2 }
  0x9c   :  { %711 = vmatpush1.bf16.msra.mxu1 %v710_v3 }
  0x9e   :  { %426 = vmatmul.mubr.f32.vlgmr.msra.gmra.mrb[0].mxu0 %v89_v4 }
  0x9f   :  { %497 = vmatmul.mubr.f32.vlgmr.msra.gmra.mrb[0].mxu1 %v89_v4 }
 0x171   :  { %v427_v12 = vpop.f32.mrb[0].mxu0 }
 0x172   :  { %v498_v13 = vpop.f32.mrb[0].mxu1  ;;  %v429_v14 = vpop.f32.mrb[1].mxu0  ;;  %v525_v22 = vadd.f32 %v508_v21, %v427_v12 }
 0x173   :  { %v527_v15 = vadd.f32 %v516_v10, %v498_v13  ;;  %v526_v16 = vadd.f32 %v512_v11, %v429_v14  ;;  %v500_v17 = vpop.f32.mrb[1].mxu1 }
 0x174   :  { %v528_v33 = vadd.f32 %v520_v27, %v500_v17 }
 0x175   :  { %v583_v18 = vmul.f32 -1.442695, %v527_v15  ;;  %v582_v19 = vmul.f32 -1.442695, %v526_v16 }
 0x177   :  { %726 = vpow2.f32 %v583_v18 }
 0x178   :  { %728 = vpow2.f32 %v582_v19 }
 0x179   :  { %730 = vtanh.f32 %v525_v22 }
 0x181   :  { %v727_v0 = vpop.eup %726 }
 0x182   :  { %v729_v23 = vpop.eup %728  ;;  %v537_v24 = vadd.f32 1.0, %v727_v0 }
 0x183   :  { %v536_v25 = vadd.f32 1.0, %v729_v23  ;;  %v731_v29 = vpop.eup %730 }
 0x184   :  { %732 = vrcp.f32 %v537_v24 }
 0x185   :  { %734 = vrcp.f32 %v536_v25 }
 0x186   :  { %736 = vtanh.f32 %v528_v33 }
 0x18e   :  { %v733_v30 = vpop.eup %732 }
 0x18f   :  { %v735_v31 = vpop.eup %734  ;;  %v544_v32 = vmul.f32 %v733_v30, %v543_v28 }
 0x190   :  { %v545_v34 = vmul.f32 %v735_v31, %v731_v29 }
 0x192   :  { %v546_v35 = vadd.f32 %v545_v34, %v544_v32 }
 0x194   :  { %738 = vtanh.f32 %v546_v35  ;;  %550 = vst [vmem:[#allocation12] sm:$0xff] %v546_v35 }
 0x195   :  { %861 = shalt.err (!%p858_p2)
}
 0x196   :  { %s862_s16 = scalar_lea.hbm %s1065_s7, 128 }
 0x197   :  { %p863_p3 = scmp.ne.s32.totalorder %s1065_s7, %s862_s16  ;;  %p866_p4 = scmp.lt.u32.totalorder %s862_s16, %s1065_s7 }
 0x199   :  { %p868_p5 = pnand %p866_p4, %p863_p3 }
 0x19b   :  { %871 = shalt.err (!%p868_p5)
}
 0x19c   :  { %570 = dma.vmem_to_hbm [thread:$0]  %s568_s23, 128, %s1065_s7, [#allocation13]   ;;  %v737_v36 = vpop.eup %736 }
 0x19d   :  { %s913_s24 = smov [#allocation11]  }
 0x19e   :  { %s557_s0 = sshll.u32 %s913_s24, 4  ;;  %v739_v37 = vpop.eup %738  ;;  %s558_s0 = int_to_ptr.vmem [resolvable:$true] %s557_s0 }
 0x19f   :  { %v548_v38 = vmul.f32 %v739_v37, %v737_v36  ;;  %s872_s25 = scalar_lea.vmem %s558_s0, 128  ;;  %p877_p7 = scmp.lt.s32.totalorder %s558_s0, %s558_s0 }
 0x1a0   :  { %p873_p6 = scmp.ne.s32.totalorder %s558_s0, %s872_s25  ;;  %p878_p8 = scmp.lt.s32.totalorder %s872_s25, %s872_s25 }
 0x1a1   :  { %549 = vst [vmem:[#allocation11] sm:$0xff] %v548_v38 }
 0x1a2   :  { %p879_p9 = por %p878_p8, %p877_p7 }
 0x1a4   :  { %p880_p10 = pnand %p879_p9, %p873_p6 }
 0x1a6   :  { %883 = shalt.err (!%p880_p10)
}
 0x1a7   :  { %s884_s29 = scalar_lea.hbm %s1064_s6, 128 }
 0x1a8   :  { %p885_p11 = scmp.ne.s32.totalorder %s1064_s6, %s884_s29  ;;  %p888_p12 = scmp.lt.u32.totalorder %s884_s29, %s1064_s6 }
 0x1aa   :  { %p890_p13 = pnand %p888_p12, %p885_p11 }
 0x1ac   :  { %893 = shalt.err (!%p890_p13)
}
 0x1ad   :  { %560 = dma.vmem_to_hbm [thread:$0]  %s558_s0, 128, %s1064_s6, [#allocation4]  }
 0x1ae   :  { %900 = dma.done.wait [#allocation4], 128  }
 0x1af   :  { %901 = vsyncadd [#allocation4], 4294967168 }
 0x1b0   :  { %902 = dma.done.wait [#allocation13], 128  }
 0x1b1   :  { %903 = vsyncadd [#allocation13], 4294967168 }
 0x1b2   :  { %577 = vsyncpa [#allocation3], 1 }
 0x1b3   :  { %578 = vsyncpa [#allocation6], 1 }
 0x1b4   :  { %579 = vsyncpa [#allocation9], 1 }
 0x1b5   :  { %580 = vsyncpa [#allocation4], 1 }
 0x1b6   :  { %581 = vsyncpa [#allocation13], 1 }

</bundles_post_ra>
